<compile_context>
chip_gen: v7x
topology: tpu7x:2x2x1
jax: 0.10.0
libtpu: 0.0.40
codegen_flags: <defaults>
</compile_context>

<pallas_src>
import functools

import jax
import jax.numpy as jnp
from jax import lax
from jax.experimental import pallas as pl
from jax.experimental.pallas import tpu as pltpu


# ----------------------------- Fused Pallas kernel --------------------------


def fused_kernel(S, B_pad, H, L,
                 x_ref, emb_ref, wih0_ref, b0_ref, wrec_ref, brec_ref,
                 wout_ref, bout_ref,
                 logits_ref, hcat_ref, ccat_ref,
                 gx_ref):
    """Fused forward pass.

    inputs : x (S*Bpad, V), emb (V, E),
             wih0_exp (E, 4LH), b0_exp (1, 4LH)      -- layer-0 input proj, gate-grouped
             wrec (LH, 4LH), brec (1, 4LH)           -- block-fused recurrent weights
             w_out_pad (H, Vpad), b_out_pad (1, Vpad)
    outputs: logits (S*Bpad, Vpad), h_cat (Bpad, LH), c_cat (Bpad, LH)
    scratch: gx (S, Bpad, 4LH) VMEM
    """
    V = x_ref.shape[1]
    LH = L * H
    GLH = 4 * LH

    # ---- embedding: argmax (first-max ties, == torch.argmax) -> one-hot matmul ----
    x = x_ref[...]                                                # (S*Bpad, V)
    m = jnp.max(x, axis=-1, keepdims=True)
    viota = lax.broadcasted_iota(jnp.int32, x.shape, 1)
    idx = jnp.min(jnp.where(x == m, viota, jnp.int32(V)), axis=-1, keepdims=True)
    onehot = (viota == idx).astype(jnp.float32)
    emb_out = jnp.dot(onehot, emb_ref[...],
                      preferred_element_type=jnp.float32)         # (S*Bpad, E)

    # ---- hoisted layer-0 input projection for the whole sequence (one MXU pass),
    #      staged into a tile-aligned VMEM scratch (S, 8, 256) ----
    gx = jnp.dot(emb_out, wih0_ref[...],
                 preferred_element_type=jnp.float32) + b0_ref[...]
    gx_ref[...] = gx.reshape(S, B_pad, GLH)

    wrec = wrec_ref[...]
    brec = brec_ref[...]

    # sigmoid(x) = 0.5*tanh(0.5*x)+0.5 : scale i/f/o gate lanes by 0.5, g lanes by 1.0
    col = lax.broadcasted_iota(jnp.int32, (1, GLH), 1)
    gscale = jnp.where((col >= 2 * LH) & (col < 3 * LH), 1.0, 0.5).astype(jnp.float32)
    lane = lax.broadcasted_iota(jnp.int32, (B_pad, LH), 1)

    # fused hidden/cell state: lanes [l*H:(l+1)*H] belong to layer l
    h_cat = jnp.zeros((B_pad, LH), jnp.float32)
    c_cat = jnp.zeros((B_pad, LH), jnp.float32)
    ys = []                                                       # last-layer h per step

    # ---- wavefront recurrence: wave w runs layer l at timestep t = w - l ----
    for w in range(S + L - 1):
        gates = jnp.dot(h_cat, wrec, preferred_element_type=jnp.float32) + brec
        if w < S:                                                 # layer-0 input term
            gates = gates + gx_ref[w]                             # (Bpad, 256) aligned load
        th = jnp.tanh(gates * gscale)                             # single EUP pass over gates
        i_all = 0.5 * th[:, 0 * LH:1 * LH] + 0.5
        f_all = 0.5 * th[:, 1 * LH:2 * LH] + 0.5
        g_all = th[:, 2 * LH:3 * LH]
        o_all = 0.5 * th[:, 3 * LH:4 * LH] + 0.5
        c_new = f_all * c_cat + i_all * g_all
        h_new = o_all * jnp.tanh(c_new)

        lo = max(0, w - S + 1)                                    # active layer range (static)
        hi = min(w, L - 1)
        if lo == 0 and hi == L - 1:                               # interior wave: no mask
            c_cat, h_cat = c_new, h_new
        else:                                                     # boundary wave: mask lanes
            amask = (lane >= lo * H) & (lane < (hi + 1) * H)
            c_cat = jnp.where(amask, c_new, c_cat)
            h_cat = jnp.where(amask, h_new, h_cat)

        if w >= L - 1:                                            # last layer produced step w-(L-1)
            ys.append(h_new[:, (L - 1) * H:L * H])

    # ---- final states written exactly once ----
    hcat_ref[...] = h_cat
    ccat_ref[...] = c_cat

    # ---- output projection: one dense matmul + one lane-dense store ----
    ys_all = jnp.concatenate(ys, axis=0)                          # (S*Bpad, H), time-major
    logits_ref[...] = (jnp.dot(ys_all, wout_ref[...],
                               preferred_element_type=jnp.float32)
                       + bout_ref[...])


# ----------------------------- Pallas wrapper --------------------------------


def _full_spec(a):
    nd = a.ndim
    return pl.BlockSpec(a.shape, lambda *_, nd=nd: (0,) * nd)


@jax.jit
def text_generation_forward(x, params):
    """x: (B, S, V) float32. Returns (logits (B,V,S), (h_n, c_n) each (L,B,H))."""
    B, S, V = x.shape
    emb = params["embedding"]                       # (V, E)
    wih_t = params["wih_t"]                         # list: (E,4H), then (H,4H)...
    whh_t = params["whh_t"]                         # list of (H, 4H)
    b_lstm = params["b_lstm"]                       # list of (1, 4H)
    H = whh_t[0].shape[0]
    L = len(wih_t)
    LH = L * H
    GLH = 4 * LH
    B_pad = ((B + 7) // 8) * 8                      # sublane-align batch
    V_pad = ((V + 127) // 128) * 128                # lane-dense logits

    # ---- weight folding: grouped-by-gate fused layouts (pure weight preprocessing) ---
    # column block for (gate g, layer l) lives at [g*LH + l*H : g*LH + (l+1)*H]
    def grouped_cols(w_l, l):
        out = jnp.zeros((w_l.shape[0], GLH), jnp.float32)
        for g in range(4):                          # PyTorch gate order i, f, g, o
            out = out.at[:, g * LH + l * H: g * LH + (l + 1) * H].set(
                w_l[:, g * H:(g + 1) * H])
        return out

    wih0_exp = grouped_cols(wih_t[0], 0)            # (E, GLH)
    b0_exp = grouped_cols(b_lstm[0], 0)             # (1, GLH)  (layer-0 bias lives in gx)
    wrec = jnp.zeros((LH, GLH), jnp.float32)
    brec = jnp.zeros((1, GLH), jnp.float32)
    for l in range(L):
        wrec = wrec.at[l * H:(l + 1) * H].add(grouped_cols(whh_t[l], l))
        if l >= 1:
            wrec = wrec.at[(l - 1) * H:l * H].add(grouped_cols(wih_t[l], l))
            brec = brec + grouped_cols(b_lstm[l], l)

    w_out_pad = jnp.zeros((H, V_pad), jnp.float32).at[:, :V].set(params["w_out_t"])
    b_out_pad = jnp.zeros((1, V_pad), jnp.float32).at[:, :V].set(params["b_out"])

    # ---- time-major flattening + batch padding (equivalent to x.permute(1,0,2)) ----
    x_tm = jnp.transpose(x, (1, 0, 2))                            # (S, B, V)
    x_tm = jnp.pad(x_tm, ((0, 0), (0, B_pad - B), (0, 0)))
    x_flat = x_tm.reshape(S * B_pad, V)

    inputs = [x_flat, emb, wih0_exp, b0_exp, wrec, brec, w_out_pad, b_out_pad]

    out_shape = [jax.ShapeDtypeStruct((S * B_pad, V_pad), jnp.float32),
                 jax.ShapeDtypeStruct((B_pad, LH), jnp.float32),
                 jax.ShapeDtypeStruct((B_pad, LH), jnp.float32)]
    out_specs = [pl.BlockSpec((S * B_pad, V_pad), lambda: (0, 0)),
                 pl.BlockSpec((B_pad, LH), lambda: (0, 0)),
                 pl.BlockSpec((B_pad, LH), lambda: (0, 0))]

    logits_pad, hcat, ccat = pl.pallas_call(
        functools.partial(fused_kernel, S, B_pad, H, L),
        out_shape=out_shape,
        in_specs=[_full_spec(a) for a in inputs],
        out_specs=out_specs,
        scratch_shapes=[pltpu.VMEM((S, B_pad, GLH), jnp.float32)],
    )(*inputs)

    logits = logits_pad.reshape(S, B_pad, V_pad)[:, :B, :V].transpose(1, 2, 0)  # (B,V,S)
    h_n = hcat.reshape(B_pad, L, H).transpose(1, 0, 2)[:, :B]                   # (L,B,H)
    c_n = ccat.reshape(B_pad, L, H).transpose(1, 0, 2)[:, :B]
    return logits, (h_n, c_n)


# ----------------------------- Pure JAX reference ---------------------------


def _ref_forward(x, params):
    B, S, V = x.shape
    emb_table = params["embedding"]
    H = params["whh_t"][0].shape[0]
    idx = jnp.argmax(x, axis=2)
    e = jnp.take(emb_table, idx, axis=0).astype(jnp.float32)     # (B,S,E)
    xs = jnp.transpose(e, (1, 0, 2))                             # (S,B,E)

    def run_layer(xs, wih_t, whh_t, b):
        def step(carry, x_t):
            h, c = carry
            g = x_t @ wih_t + h @ whh_t + b
            i = jax.nn.sigmoid(g[:, :H])
            f = jax.nn.sigmoid(g[:, H:2 * H])
            gg = jnp.tanh(g[:, 2 * H:3 * H])
            o = jax.nn.sigmoid(g[:, 3 * H:])
            c = f * c + i * gg
            h = o * jnp.tanh(c)
            return (h, c), h
        h0 = jnp.zeros((B, H), jnp.float32)
        c0 = jnp.zeros((B, H), jnp.float32)
        (hn, cn), ys = lax.scan(step, (h0, c0), xs)
        return ys, hn, cn

    layer_in = xs
    hs, cs = [], []
    for l in range(len(params["wih_t"])):
        layer_in, hn, cn = run_layer(layer_in, params["wih_t"][l],
                                     params["whh_t"][l], params["b_lstm"][l])
        hs.append(hn)
        cs.append(cn)
    out = layer_in @ params["w_out_t"] + params["b_out"]          # (S,B,V)
    return jnp.transpose(out, (1, 2, 0)), (jnp.stack(hs), jnp.stack(cs))


# ----------------------------- Parameter init --------------------------------


def init_params(vocab, embed, hidden, num_layers, key):
    keys = iter(jax.random.split(key, 4 + 6 * num_layers))
    k = 1.0 / jnp.sqrt(jnp.float32(hidden))
    params = {"embedding": jax.random.normal(next(keys), (vocab, embed),
                                             jnp.float32)}
    wih_t, whh_t, b_lstm = [], [], []
    in_size = embed
    for _ in range(num_layers):
        wih = jax.random.uniform(next(keys), (4 * hidden, in_size),
                                 jnp.float32, -k, k)
        whh = jax.random.uniform(next(keys), (4 * hidden, hidden),
                                 jnp.float32, -k, k)
        bih = jax.random.uniform(next(keys), (4 * hidden,), jnp.float32, -k, k)
        bhh = jax.random.uniform(next(keys), (4 * hidden,), jnp.float32, -k, k)
        wih_t.append(wih.T)
        whh_t.append(whh.T)
        b_lstm.append((bih + bhh).reshape(1, 4 * hidden))
        in_size = hidden
    params["wih_t"] = wih_t
    params["whh_t"] = whh_t
    params["b_lstm"] = b_lstm
    w_out = jax.random.uniform(next(keys), (vocab, hidden), jnp.float32, -k, k)
    b_out = jax.random.uniform(next(keys), (vocab,), jnp.float32, -k, k)
    params["w_out_t"] = w_out.T
    params["b_out"] = b_out.reshape(1, vocab)
    return params


# ----------------------------- Main ------------------------------------------


if __name__ == "__main__":
    BATCH, SEQ, VOCAB, HIDDEN, EMBED, LAYERS = 2, 8, 32, 32, 64, 2

    key = jax.random.PRNGKey(0)
    kx, kp = jax.random.split(key)
    x = jax.random.normal(kx, (BATCH, SEQ, VOCAB), jnp.float32)
    params = init_params(VOCAB, EMBED, HIDDEN, LAYERS, kp)

    logits, (h_n, c_n) = text_generation_forward(x, params)
    jax.block_until_ready((logits, h_n, c_n))

    assert logits.shape == (BATCH, VOCAB, SEQ)
    assert h_n.shape == (LAYERS, BATCH, HIDDEN)
    assert c_n.shape == (LAYERS, BATCH, HIDDEN)

    ref_logits, (ref_h, ref_c) = _ref_forward(x, params)
    assert jnp.allclose(logits, ref_logits, atol=1e-4, rtol=1e-4)
    assert jnp.allclose(h_n, ref_h, atol=1e-4, rtol=1e-4)
    assert jnp.allclose(c_n, ref_c, atol=1e-4, rtol=1e-4)

    print("KERNEL_OK")
</pallas_src>

<mosaic_0001>
module attributes {stable_mosaic.version = 11 : i64} {
  func.func @fused_kernel(%arg0: memref<64x32xf32, #tpu.memory_space<vmem>>, %arg1: memref<32x64xf32, #tpu.memory_space<vmem>>, %arg2: memref<64x256xf32, #tpu.memory_space<vmem>>, %arg3: memref<1x256xf32, #tpu.memory_space<vmem>>, %arg4: memref<64x256xf32, #tpu.memory_space<vmem>>, %arg5: memref<1x256xf32, #tpu.memory_space<vmem>>, %arg6: memref<32x128xf32, #tpu.memory_space<vmem>>, %arg7: memref<1x128xf32, #tpu.memory_space<vmem>>, %arg8: memref<64x128xf32, #tpu.memory_space<vmem>>, %arg9: memref<8x64xf32, #tpu.memory_space<vmem>>, %arg10: memref<8x64xf32, #tpu.memory_space<vmem>>, %arg11: memref<8x8x256xf32, #tpu.memory_space<vmem>>) attributes {dimension_semantics = [], scalar_prefetch = 0 : i64, scratch_operands = 1 : i64, tpu.core_type = #tpu.core_type<tc>} {
    %c0 = arith.constant 0 : index
    %c0_0 = arith.constant 0 : index
    %0 = vector.load %arg0[%c0, %c0_0] : memref<64x32xf32, #tpu.memory_space<vmem>>, vector<64x32xf32>
    %cst = arith.constant dense<0xFF800000> : vector<64xf32>
    %1 = vector.multi_reduction <maximumf>, %0, %cst [1] : vector<64x32xf32> to vector<64xf32>
    %2 = vector.shape_cast %1 : vector<64xf32> to vector<64x1xf32>
    %3 = tpu.iota {dimensions = array<i32: 1>} : vector<64x32xi32>
    %4 = vector.broadcast %2 : vector<64x1xf32> to vector<64x32xf32>
    %5 = arith.cmpf oeq, %0, %4 : vector<64x32xf32>
    %c32_i32 = arith.constant 32 : i32
    %6 = vector.broadcast %c32_i32 : i32 to vector<64x32xi32>
    %7 = arith.select %5, %3, %6 : vector<64x32xi1>, vector<64x32xi32>
    %cst_1 = arith.constant dense<2147483647> : vector<64xi32>
    %8 = vector.multi_reduction <minsi>, %7, %cst_1 [1] : vector<64x32xi32> to vector<64xi32>
    %9 = vector.shape_cast %8 : vector<64xi32> to vector<64x1xi32>
    %10 = vector.broadcast %9 : vector<64x1xi32> to vector<64x32xi32>
    %11 = arith.cmpi eq, %3, %10 : vector<64x32xi32>
    %12 = arith.extui %11 : vector<64x32xi1> to vector<64x32xi32>
    %13 = arith.sitofp %12 : vector<64x32xi32> to vector<64x32xf32>
    %c0_2 = arith.constant 0 : index
    %c0_3 = arith.constant 0 : index
    %14 = vector.load %arg1[%c0_2, %c0_3] : memref<32x64xf32, #tpu.memory_space<vmem>>, vector<32x64xf32>
    %cst_4 = arith.constant dense<0.000000e+00> : vector<64x64xf32>
    %15 = tpu.matmul %13, %14, %cst_4 {dimension_numbers = #tpu.dot_dimension_numbers<[1], [0], [0], [1], [0, 0, 1, 1], [], []>} : vector<64x32xf32>, vector<32x64xf32>, vector<64x64xf32> -> vector<64x64xf32>
    %c0_5 = arith.constant 0 : index
    %c0_6 = arith.constant 0 : index
    %16 = vector.load %arg2[%c0_5, %c0_6] : memref<64x256xf32, #tpu.memory_space<vmem>>, vector<64x256xf32>
    %cst_7 = arith.constant dense<0.000000e+00> : vector<64x256xf32>
    %17 = tpu.matmul %15, %16, %cst_7 {dimension_numbers = #tpu.dot_dimension_numbers<[1], [0], [0], [1], [0, 0, 1, 1], [], []>} : vector<64x64xf32>, vector<64x256xf32>, vector<64x256xf32> -> vector<64x256xf32>
    %c0_8 = arith.constant 0 : index
    %c0_9 = arith.constant 0 : index
    %18 = vector.load %arg3[%c0_8, %c0_9] : memref<1x256xf32, #tpu.memory_space<vmem>>, vector<1x256xf32>
    %19 = vector.broadcast %18 : vector<1x256xf32> to vector<64x256xf32>
    %20 = arith.addf %17, %19 : vector<64x256xf32>
    %21 = vector.shape_cast %20 : vector<64x256xf32> to vector<8x8x256xf32>
    %c0_10 = arith.constant 0 : index
    %c0_11 = arith.constant 0 : index
    %c0_12 = arith.constant 0 : index
    %22 = vector.load %arg11[%c0_10, %c0_11, %c0_12] : memref<8x8x256xf32, #tpu.memory_space<vmem>>, vector<8x8x256xf32>
    tpu.vector_store %arg11[%c0_10, %c0_11, %c0_12], %21 {strides = array<i32>} : memref<8x8x256xf32, #tpu.memory_space<vmem>>, vector<8x8x256xf32>,
    %c0_13 = arith.constant 0 : index
    %c0_14 = arith.constant 0 : index
    %23 = vector.load %arg4[%c0_13, %c0_14] : memref<64x256xf32, #tpu.memory_space<vmem>>, vector<64x256xf32>
    %c0_15 = arith.constant 0 : index
    %c0_16 = arith.constant 0 : index
    %24 = vector.load %arg5[%c0_15, %c0_16] : memref<1x256xf32, #tpu.memory_space<vmem>>, vector<1x256xf32>
    %25 = tpu.iota {dimensions = array<i32: 1>} : vector<1x256xi32>
    %c128_i32 = arith.constant 128 : i32
    %26 = vector.broadcast %c128_i32 : i32 to vector<1x256xi32>
    %27 = arith.cmpi sge, %25, %26 : vector<1x256xi32>
    %c192_i32 = arith.constant 192 : i32
    %28 = vector.broadcast %c192_i32 : i32 to vector<1x256xi32>
    %29 = arith.cmpi slt, %25, %28 : vector<1x256xi32>
    %30 = arith.andi %27, %29 : vector<1x256xi1>
    %cst_17 = arith.constant 1.000000e+00 : f32
    %cst_18 = arith.constant 5.000000e-01 : f32
    %31 = vector.broadcast %cst_17 : f32 to vector<1x256xf32>
    %32 = vector.broadcast %cst_18 : f32 to vector<1x256xf32>
    %33 = arith.select %30, %31, %32 : vector<1x256xi1>, vector<1x256xf32>
    %34 = tpu.iota {dimensions = array<i32: 1>} : vector<8x64xi32>
    %cst_19 = arith.constant 0.000000e+00 : f32
    %35 = vector.broadcast %cst_19 : f32 to vector<8x64xf32>
    %cst_20 = arith.constant 0.000000e+00 : f32
    %36 = vector.broadcast %cst_20 : f32 to vector<8x64xf32>
    %cst_21 = arith.constant dense<0.000000e+00> : vector<8x256xf32>
    %37 = tpu.matmul %35, %23, %cst_21 {dimension_numbers = #tpu.dot_dimension_numbers<[1], [0], [0], [1], [0, 0, 1, 1], [], []>} : vector<8x64xf32>, vector<64x256xf32>, vector<8x256xf32> -> vector<8x256xf32>
    %38 = vector.broadcast %24 : vector<1x256xf32> to vector<8x256xf32>
    %39 = arith.addf %37, %38 : vector<8x256xf32>
    %c0_22 = arith.constant 0 : index
    %c0_23 = arith.constant 0 : index
    %c0_24 = arith.constant 0 : index
    %40 = vector.load %arg11[%c0_22, %c0_23, %c0_24] : memref<8x8x256xf32, #tpu.memory_space<vmem>>, vector<1x8x256xf32>
    %41 = vector.shape_cast %40 : vector<1x8x256xf32> to vector<8x256xf32>
    %42 = arith.addf %39, %41 : vector<8x256xf32>
    %43 = vector.broadcast %33 : vector<1x256xf32> to vector<8x256xf32>
    %44 = arith.mulf %42, %43 : vector<8x256xf32>
    %45 = math.tanh %44 : vector<8x256xf32>
    %46 = vector.extract_strided_slice %45 {offsets = [0, 0], sizes = [8, 64], strides = [1, 1]} : vector<8x256xf32> to vector<8x64xf32>
    %cst_25 = arith.constant 5.000000e-01 : f32
    %47 = vector.broadcast %cst_25 : f32 to vector<8x64xf32>
    %48 = arith.mulf %47, %46 : vector<8x64xf32>
    %cst_26 = arith.constant 5.000000e-01 : f32
    %49 = vector.broadcast %cst_26 : f32 to vector<8x64xf32>
    %50 = arith.addf %48, %49 : vector<8x64xf32>
    %51 = vector.extract_strided_slice %45 {offsets = [0, 64], sizes = [8, 64], strides = [1, 1]} : vector<8x256xf32> to vector<8x64xf32>
    %cst_27 = arith.constant 5.000000e-01 : f32
    %52 = vector.broadcast %cst_27 : f32 to vector<8x64xf32>
    %53 = arith.mulf %52, %51 : vector<8x64xf32>
    %cst_28 = arith.constant 5.000000e-01 : f32
    %54 = vector.broadcast %cst_28 : f32 to vector<8x64xf32>
    %55 = arith.addf %53, %54 : vector<8x64xf32>
    %56 = vector.extract_strided_slice %45 {offsets = [0, 128], sizes = [8, 64], strides = [1, 1]} : vector<8x256xf32> to vector<8x64xf32>
    %57 = vector.extract_strided_slice %45 {offsets = [0, 192], sizes = [8, 64], strides = [1, 1]} : vector<8x256xf32> to vector<8x64xf32>
    %cst_29 = arith.constant 5.000000e-01 : f32
    %58 = vector.broadcast %cst_29 : f32 to vector<8x64xf32>
    %59 = arith.mulf %58, %57 : vector<8x64xf32>
    %cst_30 = arith.constant 5.000000e-01 : f32
    %60 = vector.broadcast %cst_30 : f32 to vector<8x64xf32>
    %61 = arith.addf %59, %60 : vector<8x64xf32>
    %62 = arith.mulf %55, %36 : vector<8x64xf32>
    %63 = arith.mulf %50, %56 : vector<8x64xf32>
    %64 = arith.addf %62, %63 : vector<8x64xf32>
    %65 = math.tanh %64 : vector<8x64xf32>
    %66 = arith.mulf %61, %65 : vector<8x64xf32>
    %c0_i32 = arith.constant 0 : i32
    %67 = vector.broadcast %c0_i32 : i32 to vector<8x64xi32>
    %68 = arith.cmpi sge, %34, %67 : vector<8x64xi32>
    %c32_i32_31 = arith.constant 32 : i32
    %69 = vector.broadcast %c32_i32_31 : i32 to vector<8x64xi32>
    %70 = arith.cmpi slt, %34, %69 : vector<8x64xi32>
    %71 = arith.andi %68, %70 : vector<8x64xi1>
    %72 = arith.select %71, %64, %36 : vector<8x64xi1>, vector<8x64xf32>
    %73 = arith.select %71, %66, %35 : vector<8x64xi1>, vector<8x64xf32>
    %cst_32 = arith.constant dense<0.000000e+00> : vector<8x256xf32>
    %74 = tpu.matmul %73, %23, %cst_32 {dimension_numbers = #tpu.dot_dimension_numbers<[1], [0], [0], [1], [0, 0, 1, 1], [], []>} : vector<8x64xf32>, vector<64x256xf32>, vector<8x256xf32> -> vector<8x256xf32>
    %75 = vector.broadcast %24 : vector<1x256xf32> to vector<8x256xf32>
    %76 = arith.addf %74, %75 : vector<8x256xf32>
    %c1 = arith.constant 1 : index
    %c0_33 = arith.constant 0 : index
    %c0_34 = arith.constant 0 : index
    %77 = vector.load %arg11[%c1, %c0_33, %c0_34] : memref<8x8x256xf32, #tpu.memory_space<vmem>>, vector<1x8x256xf32>
    %78 = vector.shape_cast %77 : vector<1x8x256xf32> to vector<8x256xf32>
    %79 = arith.addf %76, %78 : vector<8x256xf32>
    %80 = vector.broadcast %33 : vector<1x256xf32> to vector<8x256xf32>
    %81 = arith.mulf %79, %80 : vector<8x256xf32>
    %82 = math.tanh %81 : vector<8x256xf32>
    %83 = vector.extract_strided_slice %82 {offsets = [0, 0], sizes = [8, 64], strides = [1, 1]} : vector<8x256xf32> to vector<8x64xf32>
    %cst_35 = arith.constant 5.000000e-01 : f32
    %84 = vector.broadcast %cst_35 : f32 to vector<8x64xf32>
    %85 = arith.mulf %84, %83 : vector<8x64xf32>
    %cst_36 = arith.constant 5.000000e-01 : f32
    %86 = vector.broadcast %cst_36 : f32 to vector<8x64xf32>
    %87 = arith.addf %85, %86 : vector<8x64xf32>
    %88 = vector.extract_strided_slice %82 {offsets = [0, 64], sizes = [8, 64], strides = [1, 1]} : vector<8x256xf32> to vector<8x64xf32>
    %cst_37 = arith.constant 5.000000e-01 : f32
    %89 = vector.broadcast %cst_37 : f32 to vector<8x64xf32>
    %90 = arith.mulf %89, %88 : vector<8x64xf32>
    %cst_38 = arith.constant 5.000000e-01 : f32
    %91 = vector.broadcast %cst_38 : f32 to vector<8x64xf32>
    %92 = arith.addf %90, %91 : vector<8x64xf32>
    %93 = vector.extract_strided_slice %82 {offsets = [0, 128], sizes = [8, 64], strides = [1, 1]} : vector<8x256xf32> to vector<8x64xf32>
    %94 = vector.extract_strided_slice %82 {offsets = [0, 192], sizes = [8, 64], strides = [1, 1]} : vector<8x256xf32> to vector<8x64xf32>
    %cst_39 = arith.constant 5.000000e-01 : f32
    %95 = vector.broadcast %cst_39 : f32 to vector<8x64xf32>
    %96 = arith.mulf %95, %94 : vector<8x64xf32>
    %cst_40 = arith.constant 5.000000e-01 : f32
    %97 = vector.broadcast %cst_40 : f32 to vector<8x64xf32>
    %98 = arith.addf %96, %97 : vector<8x64xf32>
    %99 = arith.mulf %92, %72 : vector<8x64xf32>
    %100 = arith.mulf %87, %93 : vector<8x64xf32>
    %101 = arith.addf %99, %100 : vector<8x64xf32>
    %102 = math.tanh %101 : vector<8x64xf32>
    %103 = arith.mulf %98, %102 : vector<8x64xf32>
    %104 = vector.extract_strided_slice %103 {offsets = [0, 32], sizes = [8, 32], strides = [1, 1]} : vector<8x64xf32> to vector<8x32xf32>
    %cst_41 = arith.constant dense<0.000000e+00> : vector<8x256xf32>
    %105 = tpu.matmul %103, %23, %cst_41 {dimension_numbers = #tpu.dot_dimension_numbers<[1], [0], [0], [1], [0, 0, 1, 1], [], []>} : vector<8x64xf32>, vector<64x256xf32>, vector<8x256xf32> -> vector<8x256xf32>
    %106 = vector.broadcast %24 : vector<1x256xf32> to vector<8x256xf32>
    %107 = arith.addf %105, %106 : vector<8x256xf32>
    %c2 = arith.constant 2 : index
    %c0_42 = arith.constant 0 : index
    %c0_43 = arith.constant 0 : index
    %108 = vector.load %arg11[%c2, %c0_42, %c0_43] : memref<8x8x256xf32, #tpu.memory_space<vmem>>, vector<1x8x256xf32>
    %109 = vector.shape_cast %108 : vector<1x8x256xf32> to vector<8x256xf32>
    %110 = arith.addf %107, %109 : vector<8x256xf32>
    %111 = vector.broadcast %33 : vector<1x256xf32> to vector<8x256xf32>
    %112 = arith.mulf %110, %111 : vector<8x256xf32>
    %113 = math.tanh %112 : vector<8x256xf32>
    %114 = vector.extract_strided_slice %113 {offsets = [0, 0], sizes = [8, 64], strides = [1, 1]} : vector<8x256xf32> to vector<8x64xf32>
    %cst_44 = arith.constant 5.000000e-01 : f32
    %115 = vector.broadcast %cst_44 : f32 to vector<8x64xf32>
    %116 = arith.mulf %115, %114 : vector<8x64xf32>
    %cst_45 = arith.constant 5.000000e-01 : f32
    %117 = vector.broadcast %cst_45 : f32 to vector<8x64xf32>
    %118 = arith.addf %116, %117 : vector<8x64xf32>
    %119 = vector.extract_strided_slice %113 {offsets = [0, 64], sizes = [8, 64], strides = [1, 1]} : vector<8x256xf32> to vector<8x64xf32>
    %cst_46 = arith.constant 5.000000e-01 : f32
    %120 = vector.broadcast %cst_46 : f32 to vector<8x64xf32>
    %121 = arith.mulf %120, %119 : vector<8x64xf32>
    %cst_47 = arith.constant 5.000000e-01 : f32
    %122 = vector.broadcast %cst_47 : f32 to vector<8x64xf32>
    %123 = arith.addf %121, %122 : vector<8x64xf32>
    %124 = vector.extract_strided_slice %113 {offsets = [0, 128], sizes = [8, 64], strides = [1, 1]} : vector<8x256xf32> to vector<8x64xf32>
    %125 = vector.extract_strided_slice %113 {offsets = [0, 192], sizes = [8, 64], strides = [1, 1]} : vector<8x256xf32> to vector<8x64xf32>
    %cst_48 = arith.constant 5.000000e-01 : f32
    %126 = vector.broadcast %cst_48 : f32 to vector<8x64xf32>
    %127 = arith.mulf %126, %125 : vector<8x64xf32>
    %cst_49 = arith.constant 5.000000e-01 : f32
    %128 = vector.broadcast %cst_49 : f32 to vector<8x64xf32>
    %129 = arith.addf %127, %128 : vector<8x64xf32>
    %130 = arith.mulf %123, %101 : vector<8x64xf32>
    %131 = arith.mulf %118, %124 : vector<8x64xf32>
    %132 = arith.addf %130, %131 : vector<8x64xf32>
    %133 = math.tanh %132 : vector<8x64xf32>
    %134 = arith.mulf %129, %133 : vector<8x64xf32>
    %135 = vector.extract_strided_slice %134 {offsets = [0, 32], sizes = [8, 32], strides = [1, 1]} : vector<8x64xf32> to vector<8x32xf32>
    %cst_50 = arith.constant dense<0.000000e+00> : vector<8x256xf32>
    %136 = tpu.matmul %134, %23, %cst_50 {dimension_numbers = #tpu.dot_dimension_numbers<[1], [0], [0], [1], [0, 0, 1, 1], [], []>} : vector<8x64xf32>, vector<64x256xf32>, vector<8x256xf32> -> vector<8x256xf32>
    %137 = vector.broadcast %24 : vector<1x256xf32> to vector<8x256xf32>
    %138 = arith.addf %136, %137 : vector<8x256xf32>
    %c3 = arith.constant 3 : index
    %c0_51 = arith.constant 0 : index
    %c0_52 = arith.constant 0 : index
    %139 = vector.load %arg11[%c3, %c0_51, %c0_52] : memref<8x8x256xf32, #tpu.memory_space<vmem>>, vector<1x8x256xf32>
    %140 = vector.shape_cast %139 : vector<1x8x256xf32> to vector<8x256xf32>
    %141 = arith.addf %138, %140 : vector<8x256xf32>
    %142 = vector.broadcast %33 : vector<1x256xf32> to vector<8x256xf32>
    %143 = arith.mulf %141, %142 : vector<8x256xf32>
    %144 = math.tanh %143 : vector<8x256xf32>
    %145 = vector.extract_strided_slice %144 {offsets = [0, 0], sizes = [8, 64], strides = [1, 1]} : vector<8x256xf32> to vector<8x64xf32>
    %cst_53 = arith.constant 5.000000e-01 : f32
    %146 = vector.broadcast %cst_53 : f32 to vector<8x64xf32>
    %147 = arith.mulf %146, %145 : vector<8x64xf32>
    %cst_54 = arith.constant 5.000000e-01 : f32
    %148 = vector.broadcast %cst_54 : f32 to vector<8x64xf32>
    %149 = arith.addf %147, %148 : vector<8x64xf32>
    %150 = vector.extract_strided_slice %144 {offsets = [0, 64], sizes = [8, 64], strides = [1, 1]} : vector<8x256xf32> to vector<8x64xf32>
    %cst_55 = arith.constant 5.000000e-01 : f32
    %151 = vector.broadcast %cst_55 : f32 to vector<8x64xf32>
    %152 = arith.mulf %151, %150 : vector<8x64xf32>
    %cst_56 = arith.constant 5.000000e-01 : f32
    %153 = vector.broadcast %cst_56 : f32 to vector<8x64xf32>
    %154 = arith.addf %152, %153 : vector<8x64xf32>
    %155 = vector.extract_strided_slice %144 {offsets = [0, 128], sizes = [8, 64], strides = [1, 1]} : vector<8x256xf32> to vector<8x64xf32>
    %156 = vector.extract_strided_slice %144 {offsets = [0, 192], sizes = [8, 64], strides = [1, 1]} : vector<8x256xf32> to vector<8x64xf32>
    %cst_57 = arith.constant 5.000000e-01 : f32
    %157 = vector.broadcast %cst_57 : f32 to vector<8x64xf32>
    %158 = arith.mulf %157, %156 : vector<8x64xf32>
    %cst_58 = arith.constant 5.000000e-01 : f32
    %159 = vector.broadcast %cst_58 : f32 to vector<8x64xf32>
    %160 = arith.addf %158, %159 : vector<8x64xf32>
    %161 = arith.mulf %154, %132 : vector<8x64xf32>
    %162 = arith.mulf %149, %155 : vector<8x64xf32>
    %163 = arith.addf %161, %162 : vector<8x64xf32>
    %164 = math.tanh %163 : vector<8x64xf32>
    %165 = arith.mulf %160, %164 : vector<8x64xf32>
    %166 = vector.extract_strided_slice %165 {offsets = [0, 32], sizes = [8, 32], strides = [1, 1]} : vector<8x64xf32> to vector<8x32xf32>
    %cst_59 = arith.constant dense<0.000000e+00> : vector<8x256xf32>
    %167 = tpu.matmul %165, %23, %cst_59 {dimension_numbers = #tpu.dot_dimension_numbers<[1], [0], [0], [1], [0, 0, 1, 1], [], []>} : vector<8x64xf32>, vector<64x256xf32>, vector<8x256xf32> -> vector<8x256xf32>
    %168 = vector.broadcast %24 : vector<1x256xf32> to vector<8x256xf32>
    %169 = arith.addf %167, %168 : vector<8x256xf32>
    %c4 = arith.constant 4 : index
    %c0_60 = arith.constant 0 : index
    %c0_61 = arith.constant 0 : index
    %170 = vector.load %arg11[%c4, %c0_60, %c0_61] : memref<8x8x256xf32, #tpu.memory_space<vmem>>, vector<1x8x256xf32>
    %171 = vector.shape_cast %170 : vector<1x8x256xf32> to vector<8x256xf32>
    %172 = arith.addf %169, %171 : vector<8x256xf32>
    %173 = vector.broadcast %33 : vector<1x256xf32> to vector<8x256xf32>
    %174 = arith.mulf %172, %173 : vector<8x256xf32>
    %175 = math.tanh %174 : vector<8x256xf32>
    %176 = vector.extract_strided_slice %175 {offsets = [0, 0], sizes = [8, 64], strides = [1, 1]} : vector<8x256xf32> to vector<8x64xf32>
    %cst_62 = arith.constant 5.000000e-01 : f32
    %177 = vector.broadcast %cst_62 : f32 to vector<8x64xf32>
    %178 = arith.mulf %177, %176 : vector<8x64xf32>
    %cst_63 = arith.constant 5.000000e-01 : f32
    %179 = vector.broadcast %cst_63 : f32 to vector<8x64xf32>
    %180 = arith.addf %178, %179 : vector<8x64xf32>
    %181 = vector.extract_strided_slice %175 {offsets = [0, 64], sizes = [8, 64], strides = [1, 1]} : vector<8x256xf32> to vector<8x64xf32>
    %cst_64 = arith.constant 5.000000e-01 : f32
    %182 = vector.broadcast %cst_64 : f32 to vector<8x64xf32>
    %183 = arith.mulf %182, %181 : vector<8x64xf32>
    %cst_65 = arith.constant 5.000000e-01 : f32
    %184 = vector.broadcast %cst_65 : f32 to vector<8x64xf32>
    %185 = arith.addf %183, %184 : vector<8x64xf32>
    %186 = vector.extract_strided_slice %175 {offsets = [0, 128], sizes = [8, 64], strides = [1, 1]} : vector<8x256xf32> to vector<8x64xf32>
    %187 = vector.extract_strided_slice %175 {offsets = [0, 192], sizes = [8, 64], strides = [1, 1]} : vector<8x256xf32> to vector<8x64xf32>
    %cst_66 = arith.constant 5.000000e-01 : f32
    %188 = vector.broadcast %cst_66 : f32 to vector<8x64xf32>
    %189 = arith.mulf %188, %187 : vector<8x64xf32>
    %cst_67 = arith.constant 5.000000e-01 : f32
    %190 = vector.broadcast %cst_67 : f32 to vector<8x64xf32>
    %191 = arith.addf %189, %190 : vector<8x64xf32>
    %192 = arith.mulf %185, %163 : vector<8x64xf32>
    %193 = arith.mulf %180, %186 : vector<8x64xf32>
    %194 = arith.addf %192, %193 : vector<8x64xf32>
    %195 = math.tanh %194 : vector<8x64xf32>
    %196 = arith.mulf %191, %195 : vector<8x64xf32>
    %197 = vector.extract_strided_slice %196 {offsets = [0, 32], sizes = [8, 32], strides = [1, 1]} : vector<8x64xf32> to vector<8x32xf32>
    %cst_68 = arith.constant dense<0.000000e+00> : vector<8x256xf32>
    %198 = tpu.matmul %196, %23, %cst_68 {dimension_numbers = #tpu.dot_dimension_numbers<[1], [0], [0], [1], [0, 0, 1, 1], [], []>} : vector<8x64xf32>, vector<64x256xf32>, vector<8x256xf32> -> vector<8x256xf32>
    %199 = vector.broadcast %24 : vector<1x256xf32> to vector<8x256xf32>
    %200 = arith.addf %198, %199 : vector<8x256xf32>
    %c5 = arith.constant 5 : index
    %c0_69 = arith.constant 0 : index
    %c0_70 = arith.constant 0 : index
    %201 = vector.load %arg11[%c5, %c0_69, %c0_70] : memref<8x8x256xf32, #tpu.memory_space<vmem>>, vector<1x8x256xf32>
    %202 = vector.shape_cast %201 : vector<1x8x256xf32> to vector<8x256xf32>
    %203 = arith.addf %200, %202 : vector<8x256xf32>
    %204 = vector.broadcast %33 : vector<1x256xf32> to vector<8x256xf32>
    %205 = arith.mulf %203, %204 : vector<8x256xf32>
    %206 = math.tanh %205 : vector<8x256xf32>
    %207 = vector.extract_strided_slice %206 {offsets = [0, 0], sizes = [8, 64], strides = [1, 1]} : vector<8x256xf32> to vector<8x64xf32>
    %cst_71 = arith.constant 5.000000e-01 : f32
    %208 = vector.broadcast %cst_71 : f32 to vector<8x64xf32>
    %209 = arith.mulf %208, %207 : vector<8x64xf32>
    %cst_72 = arith.constant 5.000000e-01 : f32
    %210 = vector.broadcast %cst_72 : f32 to vector<8x64xf32>
    %211 = arith.addf %209, %210 : vector<8x64xf32>
    %212 = vector.extract_strided_slice %206 {offsets = [0, 64], sizes = [8, 64], strides = [1, 1]} : vector<8x256xf32> to vector<8x64xf32>
    %cst_73 = arith.constant 5.000000e-01 : f32
    %213 = vector.broadcast %cst_73 : f32 to vector<8x64xf32>
    %214 = arith.mulf %213, %212 : vector<8x64xf32>
    %cst_74 = arith.constant 5.000000e-01 : f32
    %215 = vector.broadcast %cst_74 : f32 to vector<8x64xf32>
    %216 = arith.addf %214, %215 : vector<8x64xf32>
    %217 = vector.extract_strided_slice %206 {offsets = [0, 128], sizes = [8, 64], strides = [1, 1]} : vector<8x256xf32> to vector<8x64xf32>
    %218 = vector.extract_strided_slice %206 {offsets = [0, 192], sizes = [8, 64], strides = [1, 1]} : vector<8x256xf32> to vector<8x64xf32>
    %cst_75 = arith.constant 5.000000e-01 : f32
    %219 = vector.broadcast %cst_75 : f32 to vector<8x64xf32>
    %220 = arith.mulf %219, %218 : vector<8x64xf32>
    %cst_76 = arith.constant 5.000000e-01 : f32
    %221 = vector.broadcast %cst_76 : f32 to vector<8x64xf32>
    %222 = arith.addf %220, %221 : vector<8x64xf32>
    %223 = arith.mulf %216, %194 : vector<8x64xf32>
    %224 = arith.mulf %211, %217 : vector<8x64xf32>
    %225 = arith.addf %223, %224 : vector<8x64xf32>
    %226 = math.tanh %225 : vector<8x64xf32>
    %227 = arith.mulf %222, %226 : vector<8x64xf32>
    %228 = vector.extract_strided_slice %227 {offsets = [0, 32], sizes = [8, 32], strides = [1, 1]} : vector<8x64xf32> to vector<8x32xf32>
    %cst_77 = arith.constant dense<0.000000e+00> : vector<8x256xf32>
    %229 = tpu.matmul %227, %23, %cst_77 {dimension_numbers = #tpu.dot_dimension_numbers<[1], [0], [0], [1], [0, 0, 1, 1], [], []>} : vector<8x64xf32>, vector<64x256xf32>, vector<8x256xf32> -> vector<8x256xf32>
    %230 = vector.broadcast %24 : vector<1x256xf32> to vector<8x256xf32>
    %231 = arith.addf %229, %230 : vector<8x256xf32>
    %c6 = arith.constant 6 : index
    %c0_78 = arith.constant 0 : index
    %c0_79 = arith.constant 0 : index
    %232 = vector.load %arg11[%c6, %c0_78, %c0_79] : memref<8x8x256xf32, #tpu.memory_space<vmem>>, vector<1x8x256xf32>
    %233 = vector.shape_cast %232 : vector<1x8x256xf32> to vector<8x256xf32>
    %234 = arith.addf %231, %233 : vector<8x256xf32>
    %235 = vector.broadcast %33 : vector<1x256xf32> to vector<8x256xf32>
    %236 = arith.mulf %234, %235 : vector<8x256xf32>
    %237 = math.tanh %236 : vector<8x256xf32>
    %238 = vector.extract_strided_slice %237 {offsets = [0, 0], sizes = [8, 64], strides = [1, 1]} : vector<8x256xf32> to vector<8x64xf32>
    %cst_80 = arith.constant 5.000000e-01 : f32
    %239 = vector.broadcast %cst_80 : f32 to vector<8x64xf32>
    %240 = arith.mulf %239, %238 : vector<8x64xf32>
    %cst_81 = arith.constant 5.000000e-01 : f32
    %241 = vector.broadcast %cst_81 : f32 to vector<8x64xf32>
    %242 = arith.addf %240, %241 : vector<8x64xf32>
    %243 = vector.extract_strided_slice %237 {offsets = [0, 64], sizes = [8, 64], strides = [1, 1]} : vector<8x256xf32> to vector<8x64xf32>
    %cst_82 = arith.constant 5.000000e-01 : f32
    %244 = vector.broadcast %cst_82 : f32 to vector<8x64xf32>
    %245 = arith.mulf %244, %243 : vector<8x64xf32>
    %cst_83 = arith.constant 5.000000e-01 : f32
    %246 = vector.broadcast %cst_83 : f32 to vector<8x64xf32>
    %247 = arith.addf %245, %246 : vector<8x64xf32>
    %248 = vector.extract_strided_slice %237 {offsets = [0, 128], sizes = [8, 64], strides = [1, 1]} : vector<8x256xf32> to vector<8x64xf32>
    %249 = vector.extract_strided_slice %237 {offsets = [0, 192], sizes = [8, 64], strides = [1, 1]} : vector<8x256xf32> to vector<8x64xf32>
    %cst_84 = arith.constant 5.000000e-01 : f32
    %250 = vector.broadcast %cst_84 : f32 to vector<8x64xf32>
    %251 = arith.mulf %250, %249 : vector<8x64xf32>
    %cst_85 = arith.constant 5.000000e-01 : f32
    %252 = vector.broadcast %cst_85 : f32 to vector<8x64xf32>
    %253 = arith.addf %251, %252 : vector<8x64xf32>
    %254 = arith.mulf %247, %225 : vector<8x64xf32>
    %255 = arith.mulf %242, %248 : vector<8x64xf32>
    %256 = arith.addf %254, %255 : vector<8x64xf32>
    %257 = math.tanh %256 : vector<8x64xf32>
    %258 = arith.mulf %253, %257 : vector<8x64xf32>
    %259 = vector.extract_strided_slice %258 {offsets = [0, 32], sizes = [8, 32], strides = [1, 1]} : vector<8x64xf32> to vector<8x32xf32>
    %cst_86 = arith.constant dense<0.000000e+00> : vector<8x256xf32>
    %260 = tpu.matmul %258, %23, %cst_86 {dimension_numbers = #tpu.dot_dimension_numbers<[1], [0], [0], [1], [0, 0, 1, 1], [], []>} : vector<8x64xf32>, vector<64x256xf32>, vector<8x256xf32> -> vector<8x256xf32>
    %261 = vector.broadcast %24 : vector<1x256xf32> to vector<8x256xf32>
    %262 = arith.addf %260, %261 : vector<8x256xf32>
    %c7 = arith.constant 7 : index
    %c0_87 = arith.constant 0 : index
    %c0_88 = arith.constant 0 : index
    %263 = vector.load %arg11[%c7, %c0_87, %c0_88] : memref<8x8x256xf32, #tpu.memory_space<vmem>>, vector<1x8x256xf32>
    %264 = vector.shape_cast %263 : vector<1x8x256xf32> to vector<8x256xf32>
    %265 = arith.addf %262, %264 : vector<8x256xf32>
    %266 = vector.broadcast %33 : vector<1x256xf32> to vector<8x256xf32>
    %267 = arith.mulf %265, %266 : vector<8x256xf32>
    %268 = math.tanh %267 : vector<8x256xf32>
    %269 = vector.extract_strided_slice %268 {offsets = [0, 0], sizes = [8, 64], strides = [1, 1]} : vector<8x256xf32> to vector<8x64xf32>
    %cst_89 = arith.constant 5.000000e-01 : f32
    %270 = vector.broadcast %cst_89 : f32 to vector<8x64xf32>
    %271 = arith.mulf %270, %269 : vector<8x64xf32>
    %cst_90 = arith.constant 5.000000e-01 : f32
    %272 = vector.broadcast %cst_90 : f32 to vector<8x64xf32>
    %273 = arith.addf %271, %272 : vector<8x64xf32>
    %274 = vector.extract_strided_slice %268 {offsets = [0, 64], sizes = [8, 64], strides = [1, 1]} : vector<8x256xf32> to vector<8x64xf32>
    %cst_91 = arith.constant 5.000000e-01 : f32
    %275 = vector.broadcast %cst_91 : f32 to vector<8x64xf32>
    %276 = arith.mulf %275, %274 : vector<8x64xf32>
    %cst_92 = arith.constant 5.000000e-01 : f32
    %277 = vector.broadcast %cst_92 : f32 to vector<8x64xf32>
    %278 = arith.addf %276, %277 : vector<8x64xf32>
    %279 = vector.extract_strided_slice %268 {offsets = [0, 128], sizes = [8, 64], strides = [1, 1]} : vector<8x256xf32> to vector<8x64xf32>
    %280 = vector.extract_strided_slice %268 {offsets = [0, 192], sizes = [8, 64], strides = [1, 1]} : vector<8x256xf32> to vector<8x64xf32>
    %cst_93 = arith.constant 5.000000e-01 : f32
    %281 = vector.broadcast %cst_93 : f32 to vector<8x64xf32>
    %282 = arith.mulf %281, %280 : vector<8x64xf32>
    %cst_94 = arith.constant 5.000000e-01 : f32
    %283 = vector.broadcast %cst_94 : f32 to vector<8x64xf32>
    %284 = arith.addf %282, %283 : vector<8x64xf32>
    %285 = arith.mulf %278, %256 : vector<8x64xf32>
    %286 = arith.mulf %273, %279 : vector<8x64xf32>
    %287 = arith.addf %285, %286 : vector<8x64xf32>
    %288 = math.tanh %287 : vector<8x64xf32>
    %289 = arith.mulf %284, %288 : vector<8x64xf32>
    %290 = vector.extract_strided_slice %289 {offsets = [0, 32], sizes = [8, 32], strides = [1, 1]} : vector<8x64xf32> to vector<8x32xf32>
    %cst_95 = arith.constant dense<0.000000e+00> : vector<8x256xf32>
    %291 = tpu.matmul %289, %23, %cst_95 {dimension_numbers = #tpu.dot_dimension_numbers<[1], [0], [0], [1], [0, 0, 1, 1], [], []>} : vector<8x64xf32>, vector<64x256xf32>, vector<8x256xf32> -> vector<8x256xf32>
    %292 = vector.broadcast %24 : vector<1x256xf32> to vector<8x256xf32>
    %293 = arith.addf %291, %292 : vector<8x256xf32>
    %294 = vector.broadcast %33 : vector<1x256xf32> to vector<8x256xf32>
    %295 = arith.mulf %293, %294 : vector<8x256xf32>
    %296 = math.tanh %295 : vector<8x256xf32>
    %297 = vector.extract_strided_slice %296 {offsets = [0, 0], sizes = [8, 64], strides = [1, 1]} : vector<8x256xf32> to vector<8x64xf32>
    %cst_96 = arith.constant 5.000000e-01 : f32
    %298 = vector.broadcast %cst_96 : f32 to vector<8x64xf32>
    %299 = arith.mulf %298, %297 : vector<8x64xf32>
    %cst_97 = arith.constant 5.000000e-01 : f32
    %300 = vector.broadcast %cst_97 : f32 to vector<8x64xf32>
    %301 = arith.addf %299, %300 : vector<8x64xf32>
    %302 = vector.extract_strided_slice %296 {offsets = [0, 64], sizes = [8, 64], strides = [1, 1]} : vector<8x256xf32> to vector<8x64xf32>
    %cst_98 = arith.constant 5.000000e-01 : f32
    %303 = vector.broadcast %cst_98 : f32 to vector<8x64xf32>
    %304 = arith.mulf %303, %302 : vector<8x64xf32>
    %cst_99 = arith.constant 5.000000e-01 : f32
    %305 = vector.broadcast %cst_99 : f32 to vector<8x64xf32>
    %306 = arith.addf %304, %305 : vector<8x64xf32>
    %307 = vector.extract_strided_slice %296 {offsets = [0, 128], sizes = [8, 64], strides = [1, 1]} : vector<8x256xf32> to vector<8x64xf32>
    %308 = vector.extract_strided_slice %296 {offsets = [0, 192], sizes = [8, 64], strides = [1, 1]} : vector<8x256xf32> to vector<8x64xf32>
    %cst_100 = arith.constant 5.000000e-01 : f32
    %309 = vector.broadcast %cst_100 : f32 to vector<8x64xf32>
    %310 = arith.mulf %309, %308 : vector<8x64xf32>
    %cst_101 = arith.constant 5.000000e-01 : f32
    %311 = vector.broadcast %cst_101 : f32 to vector<8x64xf32>
    %312 = arith.addf %310, %311 : vector<8x64xf32>
    %313 = arith.mulf %306, %287 : vector<8x64xf32>
    %314 = arith.mulf %301, %307 : vector<8x64xf32>
    %315 = arith.addf %313, %314 : vector<8x64xf32>
    %316 = math.tanh %315 : vector<8x64xf32>
    %317 = arith.mulf %312, %316 : vector<8x64xf32>
    %c32_i32_102 = arith.constant 32 : i32
    %318 = vector.broadcast %c32_i32_102 : i32 to vector<8x64xi32>
    %319 = arith.cmpi sge, %34, %318 : vector<8x64xi32>
    %c64_i32 = arith.constant 64 : i32
    %320 = vector.broadcast %c64_i32 : i32 to vector<8x64xi32>
    %321 = arith.cmpi slt, %34, %320 : vector<8x64xi32>
    %322 = arith.andi %319, %321 : vector<8x64xi1>
    %323 = arith.select %322, %315, %287 : vector<8x64xi1>, vector<8x64xf32>
    %324 = arith.select %322, %317, %289 : vector<8x64xi1>, vector<8x64xf32>
    %325 = vector.extract_strided_slice %317 {offsets = [0, 32], sizes = [8, 32], strides = [1, 1]} : vector<8x64xf32> to vector<8x32xf32>
    %c0_103 = arith.constant 0 : index
    %c0_104 = arith.constant 0 : index
    %326 = vector.load %arg9[%c0_103, %c0_104] : memref<8x64xf32, #tpu.memory_space<vmem>>, vector<8x64xf32>
    tpu.vector_store %arg9[%c0_103, %c0_104], %324 {strides = array<i32>} : memref<8x64xf32, #tpu.memory_space<vmem>>, vector<8x64xf32>,
    %c0_105 = arith.constant 0 : index
    %c0_106 = arith.constant 0 : index
    %327 = vector.load %arg10[%c0_105, %c0_106] : memref<8x64xf32, #tpu.memory_space<vmem>>, vector<8x64xf32>
    tpu.vector_store %arg10[%c0_105, %c0_106], %323 {strides = array<i32>} : memref<8x64xf32, #tpu.memory_space<vmem>>, vector<8x64xf32>,
    %328 = tpu.concatenate %104, %135, %166, %197, %228, %259, %290, %325 in 0 : vector<8x32xf32>, vector<8x32xf32>, vector<8x32xf32>, vector<8x32xf32>, vector<8x32xf32>, vector<8x32xf32>, vector<8x32xf32>, vector<8x32xf32> -> vector<64x32xf32>
    %c0_107 = arith.constant 0 : index
    %c0_108 = arith.constant 0 : index
    %329 = vector.load %arg6[%c0_107, %c0_108] : memref<32x128xf32, #tpu.memory_space<vmem>>, vector<32x128xf32>
    %cst_109 = arith.constant dense<0.000000e+00> : vector<64x128xf32>
    %330 = tpu.matmul %328, %329, %cst_109 {dimension_numbers = #tpu.dot_dimension_numbers<[1], [0], [0], [1], [0, 0, 1, 1], [], []>} : vector<64x32xf32>, vector<32x128xf32>, vector<64x128xf32> -> vector<64x128xf32>
    %c0_110 = arith.constant 0 : index
    %c0_111 = arith.constant 0 : index
    %331 = vector.load %arg7[%c0_110, %c0_111] : memref<1x128xf32, #tpu.memory_space<vmem>>, vector<1x128xf32>
    %332 = vector.broadcast %331 : vector<1x128xf32> to vector<64x128xf32>
    %333 = arith.addf %330, %332 : vector<64x128xf32>
    %c0_112 = arith.constant 0 : index
    %c0_113 = arith.constant 0 : index
    %334 = vector.load %arg8[%c0_112, %c0_113] : memref<64x128xf32, #tpu.memory_space<vmem>>, vector<64x128xf32>
    tpu.vector_store %arg8[%c0_112, %c0_113], %333 {strides = array<i32>} : memref<64x128xf32, #tpu.memory_space<vmem>>, vector<64x128xf32>,
    return
  }
}

</mosaic_0001>

<bundles_post_ra>
// kernel: text_generation_forward.1
= control target key start
LH: loop header
LB: loop body
LE: loop exit
PB: predicated region body
PF: predicated region fallthrough
CT: control target
= control target key end

     0   :  { %vm40_vm0 = vcmask 261120   ;;  %v65_v16 = vlaneseq  ;;  %s2653_s0 = inlined_call_operand.vmem [shape: f32[64,32], index: 0, kind: input, shape index: {}]   ;;  %s2654_s1 = inlined_call_operand.vmem [shape: f32[32,64], index: 1, kind: input, shape index: {}]   ;;  %s2655_s2 = inlined_call_operand.vmem [shape: f32[64,256], index: 2, kind: input, shape index: {}]   ;;  %s2656_s4 = inlined_call_operand.vmem [shape: f32[64,256], index: 4, kind: input, shape index: {}]   ;;  %s2657_s3 = inlined_call_operand.vmem [shape: f32[1,256], index: 3, kind: input, shape index: {}]   ;;  %s2658_s5 = inlined_call_operand.vmem [shape: f32[1,256], index: 5, kind: input, shape index: {}]   ;;  %s2659_s6 = inlined_call_operand.vmem [shape: f32[32,128], index: 6, kind: input, shape index: {}]   ;;  %s2660_s9 = inlined_call_operand.vmem [shape: f32[8,64], index: 9, kind: output, shape index: {1}]   ;;  %s2661_s10 = inlined_call_operand.vmem [shape: f32[8,64], index: 10, kind: output, shape index: {2}]   ;;  %s2662_s7 = inlined_call_operand.vmem [shape: f32[1,128], index: 7, kind: input, shape index: {}]   ;;  %s2663_s8 = inlined_call_operand.vmem [shape: f32[64,128], index: 8, kind: output, shape index: {0}]  }
   0x1   :  { %v32_v0 = vld [vmem:[%s2653_s0] sm:$0xff]  ;;  %v34_v1 = vld [vmem:[%s2653_s0 + $0x10] sm:$0xff]  ;;  %v33_v2 = vld [vmem:[%s2653_s0 + $0x8] sm:$0xff] }
   0x2   :  { %v41_v3 = vsel %vm40_vm0, %v32_v0, -inf  ;;  %v47_v4 = vsel %vm40_vm0, %v34_v1, -inf  ;;  %v35_v5 = vld [vmem:[%s2653_s0 + $0x18] sm:$0xff]  ;;  %v44_v6 = vsel %vm40_vm0, %v33_v2, -inf  ;;  %v36_v8 = vld [vmem:[%s2653_s0 + $0x20] sm:$0xff]  ;;  %v37_v9 = vld [vmem:[%s2653_s0 + $0x28] sm:$0xff] }
   0x3   :  { %42 = vmax.xlane.f32.xlu0 %v41_v3  ;;  %48 = vmax.xlane.f32.xlu1 %v47_v4  ;;  %v50_v7 = vsel %vm40_vm0, %v35_v5, -inf  ;;  %v53_v10 = vsel %vm40_vm0, %v36_v8, -inf  ;;  %v56_v11 = vsel %vm40_vm0, %v37_v9, -inf  ;;  %v38_v12 = vld [vmem:[%s2653_s0 + $0x30] sm:$0xff]  ;;  %v39_v13 = vld [vmem:[%s2653_s0 + $0x38] sm:$0xff]  ;;  %v2135_v17 = vand.u32 127, %v65_v16 }
   0x4   :  { %v59_v14 = vsel %vm40_vm0, %v38_v12, -inf  ;;  %v62_v15 = vsel %vm40_vm0, %v39_v13, -inf }
   0x7   :  { %45 = vmax.xlane.f32.xlu0 %v44_v6  ;;  %51 = vmax.xlane.f32.xlu1 %v50_v7 }
   0xb   :  { %54 = vmax.xlane.f32.xlu0 %v53_v10  ;;  %57 = vmax.xlane.f32.xlu1 %v56_v11 }
   0xf   :  { %60 = vmax.xlane.f32.xlu0 %v59_v14  ;;  %63 = vmax.xlane.f32.xlu1 %v62_v15 }
  0x90   :  { %v43_v18 = vpop.xlane.xlu0 %42  ;;  %v49_v19 = vpop.xlane.xlu1 %48 }
  0x91   :  { %vm67_vm1 = vcmp.eq.f32.partialorder %v32_v0, %v43_v18  ;;  %vm69_vm2 = vcmp.eq.f32.partialorder %v34_v1, %v49_v19 }
  0x92   :  { %v75_v20 = vsel %vm67_vm1, %v2135_v17, 32  ;;  %v77_v21 = vsel %vm69_vm2, %v2135_v17, 32 }
  0x93   :  { %v83_v22 = vsel %vm40_vm0, %v75_v20, 2147483647  ;;  %v113_v23 = vsel %vm40_vm0, %v77_v21, 2147483647 }
  0x94   :  { %v46_v24 = vpop.xlane.xlu0 %45  ;;  %v52_v25 = vpop.xlane.xlu1 %51  ;;  %v85_v26 = vshra.s32 %v83_v22, 16  ;;  %v115_v27 = vshra.s32 %v113_v23, 16  ;;  %v84_v58 = vand.u32 65535, %v83_v22  ;;  %v114_v62 = vand.u32 65535, %v113_v23 }
  0x95   :  { %vm68_vm3 = vcmp.eq.f32.partialorder %v33_v2, %v46_v24  ;;  %vm70_vm4 = vcmp.eq.f32.partialorder %v35_v5, %v52_v25 }
  0x96   :  { %v76_v28 = vsel %vm68_vm3, %v2135_v17, 32  ;;  %v78_v29 = vsel %vm70_vm4, %v2135_v17, 32  ;;  %v87_v30 = vcvt.s32.f32 %v85_v26  ;;  %v117_v35 = vcvt.s32.f32 %v115_v27  ;;  %v227_v27 = vld [vmem:[%s2654_s1] sm:$0xff] }
  0x97   :  { %v98_v31 = vsel %vm40_vm0, %v76_v28, 2147483647  ;;  %v128_v32 = vsel %vm40_vm0, %v78_v29, 2147483647  ;;  %v86_v60 = vcvt.s32.f32 %v84_v58  ;;  %v116_v3 = vcvt.s32.f32 %v114_v62  ;;  %v228_v28 = vld [vmem:[%s2654_s1 + $0x8] sm:$0xff] }
  0x98   :  { %88 = vmin.xlane.f32.xlu0 %v87_v30  ;;  %v55_v33 = vpop.xlane.xlu0 %54  ;;  %v58_v34 = vpop.xlane.xlu1 %57  ;;  %v100_v36 = vshra.s32 %v98_v31, 16  ;;  %v130_v37 = vshra.s32 %v128_v32, 16  ;;  %v99_v61 = vand.u32 65535, %v98_v31  ;;  %v129_v4 = vand.u32 65535, %v128_v32  ;;  %v229_v31 = vld [vmem:[%s2654_s1 + $0x10] sm:$0xff]  ;;  %v230_v32 = vld [vmem:[%s2654_s1 + $0x18] sm:$0xff] }
  0x99   :  { %vm71_vm5 = vcmp.eq.f32.partialorder %v36_v8, %v55_v33  ;;  %vm72_vm6 = vcmp.eq.f32.partialorder %v37_v9, %v58_v34  ;;  %v1765_v33 = vpack.c.bf16 %v230_v32, %v229_v31  ;;  %v2043_v34 = vmov 0.0  }
  0x9a   :  { %v79_v38 = vsel %vm71_vm5, %v2135_v17, 32  ;;  %v80_v39 = vsel %vm72_vm6, %v2135_v17, 32  ;;  %v102_v40 = vcvt.s32.f32 %v100_v36  ;;  %v132_v45 = vcvt.s32.f32 %v130_v37  ;;  %477 = vmatprep.mubr.f32.mxu0 %v2043_v34  ;;  %v363_v36 = vld [vmem:[%s2655_s2 + $0x18] sm:$0xff]  ;;  %v360_v37 = vld [vmem:[%s2655_s2] sm:$0xff] }
  0x9b   :  { %v143_v41 = vsel %vm40_vm0, %v79_v38, 2147483647  ;;  %v158_v42 = vsel %vm40_vm0, %v80_v39, 2147483647  ;;  %v101_v2 = vcvt.s32.f32 %v99_v61  ;;  %v131_v10 = vcvt.s32.f32 %v129_v4  ;;  %v362_v39 = vld [vmem:[%s2655_s2 + $0x10] sm:$0xff] }
  0x9c   :  { %118 = vmin.xlane.f32.xlu0 %v117_v35  ;;  %103 = vmin.xlane.f32.xlu1 %v102_v40  ;;  %v61_v43 = vpop.xlane.xlu0 %60  ;;  %v64_v44 = vpop.xlane.xlu1 %63  ;;  %v145_v46 = vshra.s32 %v143_v41, 16  ;;  %v160_v47 = vshra.s32 %v158_v42, 16  ;;  %v144_v5 = vand.u32 65535, %v143_v41  ;;  %v367_v41 = vld [vmem:[%s2655_s2 + $0x38] sm:$0xff] }
  0x9d   :  { %vm73_vm7 = vcmp.eq.f32.partialorder %v38_v12, %v61_v43  ;;  %vm74_vm8 = vcmp.eq.f32.partialorder %v39_v13, %v64_v44  ;;  %v159_v12 = vand.u32 65535, %v158_v42  ;;  %v1771_v42 = vpack.c.bf16 %v362_v39, %v360_v37  ;;  %v364_v44 = vld [vmem:[%s2655_s2 + $0x20] sm:$0xff] }
  0x9e   :  { %v81_v48 = vsel %vm73_vm7, %v2135_v17, 32  ;;  %v82_v49 = vsel %vm74_vm8, %v2135_v17, 32  ;;  %v147_v50 = vcvt.s32.f32 %v145_v46  ;;  %v162_v53 = vcvt.s32.f32 %v160_v47  ;;  %v369_v46 = vld [vmem:[%s2655_s2 + $0x48] sm:$0xff]  ;;  %v371_v47 = vld [vmem:[%s2655_s2 + $0x58] sm:$0xff] }
  0x9f   :  { %v173_v51 = vsel %vm40_vm0, %v81_v48, 2147483647  ;;  %v188_v52 = vsel %vm40_vm0, %v82_v49, 2147483647  ;;  %v146_v11 = vcvt.s32.f32 %v144_v5  ;;  %v161_v20 = vcvt.s32.f32 %v159_v12 }
  0xa0   :  { %133 = vmin.xlane.f32.xlu1 %v132_v45  ;;  %148 = vmin.xlane.f32.xlu0 %v147_v50  ;;  %v175_v54 = vshra.s32 %v173_v51, 16  ;;  %v190_v55 = vshra.s32 %v188_v52, 16  ;;  %v174_v13 = vand.u32 65535, %v173_v51  ;;  %v189_v22 = vand.u32 65535, %v188_v52  ;;  %v370_v51 = vld [vmem:[%s2655_s2 + $0x50] sm:$0xff]  ;;  %v373_v52 = vld [vmem:[%s2655_s2 + $0x68] sm:$0xff] }
  0xa1   :  { %v1777_v49 = vpack.c.bf16 %v371_v47, %v369_v46  ;;  %v543_v46 = vld [vmem:[%s2656_s4 + $0x8] sm:$0xff]  ;;  %v545_v47 = vld [vmem:[%s2656_s4 + $0x18] sm:$0xff] }
  0xa2   :  { %v177_v56 = vcvt.s32.f32 %v175_v54  ;;  %v192_v57 = vcvt.s32.f32 %v190_v55  ;;  %v176_v21 = vcvt.s32.f32 %v174_v13  ;;  %v191_v26 = vcvt.s32.f32 %v189_v22 }
  0xa4   :  { %163 = vmin.xlane.f32.xlu1 %v162_v53  ;;  %178 = vmin.xlane.f32.xlu0 %v177_v56 }
  0xa8   :  { %193 = vmin.xlane.f32.xlu1 %v192_v57 }
 0x125   :  { %v2153_v59 = vpop.xlane.xlu0 %88 }
 0x126   :  { %vm90_vm9 = vcmp.eq.f32.partialorder %v87_v30, %v2153_v59  ;;  %v1761_v30 = vpack.c.bf16 %v228_v28, %v227_v27 }
 0x127   :  { %v91_v63 = vsel %vm90_vm9, %v86_v60, inf  ;;  %v95_v60 = vcvt.f32.s32 %v2153_v59 }
 0x128   :  { %92 = vmin.xlane.f32.xlu0 %v91_v63  ;;  %1762 = vmatprep.subr.bf16.mxu1 %v1761_v30 }
 0x129   :  { %v2156_v0 = vpop.xlane.xlu1 %103  ;;  %v2158_v1 = vpop.xlane.xlu0 %118  ;;  %1764 = vmatpush3.bf16.msra.mxu1 %v1761_v30  ;;  %v96_v63 = vshll.u32 %v95_v60, 16  ;;  %v553_v60 = vld [vmem:[%s2656_s4 + $0x58] sm:$0xff] }
 0x12a   :  { %vm105_vm10 = vcmp.eq.f32.partialorder %v102_v40, %v2156_v0  ;;  %vm120_vm11 = vcmp.eq.f32.partialorder %v117_v35, %v2158_v1  ;;  %1766 = vmatprep.subr.bf16.mxu1 %v1765_v33  ;;  %v361_v35 = vld [vmem:[%s2655_s2 + $0x8] sm:$0xff]  ;;  %v110_v61 = vcvt.f32.s32 %v2156_v0 }
 0x12b   :  { %v106_v6 = vsel %vm105_vm10, %v101_v2, inf  ;;  %v121_v7 = vsel %vm120_vm11, %v116_v3, inf  ;;  %v1769_v38 = vpack.c.bf16 %v363_v36, %v361_v35  ;;  %v365_v40 = vld [vmem:[%s2655_s2 + $0x28] sm:$0xff]  ;;  %v125_v2 = vcvt.f32.s32 %v2158_v1 }
 0x12c   :  { %107 = vmin.xlane.f32.xlu1 %v106_v6  ;;  %122 = vmin.xlane.f32.xlu0 %v121_v7  ;;  %v1773_v43 = vpack.c.bf16 %v367_v41, %v365_v40  ;;  %v111_v5 = vshll.u32 %v110_v61, 16  ;;  %vm388_vm10 = vcmask 523264  }
 0x12d   :  { %v2162_v8 = vpop.xlane.xlu1 %133  ;;  %v2164_v9 = vpop.xlane.xlu0 %148  ;;  %1768 = vmatpush3.bf16.msra.mxu1 %v1765_v33  ;;  %1770 = vmatprep.subr.bf16.mxu0 %v1769_v38  ;;  %v126_v12 = vshll.u32 %v125_v2, 16 }
 0x12e   :  { %vm135_vm12 = vcmp.eq.f32.partialorder %v132_v45, %v2162_v8  ;;  %vm150_vm13 = vcmp.eq.f32.partialorder %v147_v50, %v2164_v9  ;;  %v366_v45 = vld [vmem:[%s2655_s2 + $0x30] sm:$0xff]  ;;  %1772 = vmatpush1.bf16.msra.mxu0 %v1771_v42  ;;  %v368_v50 = vld [vmem:[%s2655_s2 + $0x40] sm:$0xff]  ;;  %v140_v6 = vcvt.f32.s32 %v2162_v8  ;;  %v155_v7 = vcvt.f32.s32 %v2164_v9 }
 0x12f   :  { %v136_v14 = vsel %vm135_vm12, %v131_v10, inf  ;;  %v151_v15 = vsel %vm150_vm13, %v146_v11, inf  ;;  %v1775_v48 = vpack.c.bf16 %v366_v45, %v364_v44  ;;  %1774 = vmatprep.subr.bf16.mxu0 %v1773_v43  ;;  %v1779_v54 = vpack.c.bf16 %v370_v51, %v368_v50  ;;  %v544_v50 = vld [vmem:[%s2656_s4 + $0x10] sm:$0xff] }
 0x130   :  { %137 = vmin.xlane.f32.xlu1 %v136_v14  ;;  %152 = vmin.xlane.f32.xlu0 %v151_v15  ;;  %v141_v1 = vshll.u32 %v140_v6, 16  ;;  %v554_v6 = vld [vmem:[%s2656_s4 + $0x60] sm:$0xff]  ;;  %vm675_vm12 = vcmp.lt.s32.totalorder %v2135_v17, 32  ;;  %vm1468_vm13 = vcmp.ge.s32.totalorder %v2135_v17, 32 }
 0x131   :  { %v2168_v18 = vpop.xlane.xlu1 %163  ;;  %v2170_v19 = vpop.xlane.xlu0 %178 }
 0x132   :  { %vm165_vm14 = vcmp.eq.f32.partialorder %v162_v53, %v2168_v18  ;;  %vm180_vm15 = vcmp.eq.f32.partialorder %v177_v56, %v2170_v19  ;;  %v375_v53 = vld [vmem:[%s2655_s2 + $0x78] sm:$0xff]  ;;  %1776 = vmatpush1.bf16.msra.mxu0 %v1775_v48  ;;  %v372_v56 = vld [vmem:[%s2655_s2 + $0x60] sm:$0xff]  ;;  %v185_v8 = vcvt.f32.s32 %v2170_v19 }
 0x133   :  { %v166_v23 = vsel %vm165_vm14, %v161_v20, inf  ;;  %v181_v24 = vsel %vm180_vm15, %v176_v21, inf  ;;  %1778 = vmatprep.subr.bf16.mxu0 %v1777_v49  ;;  %v1781_v55 = vpack.c.bf16 %v375_v53, %v373_v52  ;;  %v156_v20 = vshll.u32 %v155_v7, 16  ;;  %v542_v48 = vld [vmem:[%s2656_s4] sm:$0xff]  ;;  %v547_v52 = vld [vmem:[%s2656_s4 + $0x28] sm:$0xff]  ;;  %v549_v53 = vld [vmem:[%s2656_s4 + $0x38] sm:$0xff] }
 0x134   :  { %167 = vmin.xlane.f32.xlu1 %v166_v23  ;;  %182 = vmin.xlane.f32.xlu0 %v181_v24  ;;  %v170_v21 = vcvt.f32.s32 %v2168_v18  ;;  %v186_v18 = vshll.u32 %v185_v8, 16  ;;  %v2280_v49 = vpack.c.bf16 %v545_v47, %v543_v46  ;;  %v2285_v51 = vpack.c.bf16 %v544_v50, %v542_v48  ;;  %v556_v7 = vld [vmem:[%s2656_s4 + $0x70] sm:$0xff] }
 0x135   :  { %v2174_v25 = vpop.xlane.xlu1 %193  ;;  %vm1469_vm14 = vcmp.lt.s32.totalorder %v2135_v17, 64 }
 0x136   :  { %vm195_vm1 = vcmp.eq.f32.partialorder %v192_v57, %v2174_v25  ;;  %v374_v57 = vld [vmem:[%s2655_s2 + $0x70] sm:$0xff]  ;;  %1780 = vmatpush1.bf16.msra.mxu0 %v1779_v54  ;;  %v171_v30 = vshll.u32 %v170_v21, 16  ;;  %v200_v19 = vcvt.f32.s32 %v2174_v25  ;;  %1818 = vmatprep.subr.bf16.mxu1 %v2280_v49  ;;  %v2296_v54 = vpack.c.bf16 %v549_v53, %v547_v52  ;;  %vm1470_vm15 = vmand %vm1468_vm13, %vm1469_vm14 }
 0x137   :  { %v196_v29 = vsel %vm195_vm1, %v191_v26, inf  ;;  %v1783_v58 = vpack.c.bf16 %v374_v57, %v372_v56  ;;  %1782 = vmatprep.subr.bf16.mxu0 %v1781_v55  ;;  %v546_v55 = vld [vmem:[%s2656_s4 + $0x20] sm:$0xff]  ;;  %v548_v56 = vld [vmem:[%s2656_s4 + $0x30] sm:$0xff] }
 0x138   :  { %197 = vmin.xlane.f32.xlu1 %v196_v29  ;;  %v201_v25 = vshll.u32 %v200_v19, 16  ;;  %v2304_v57 = vpack.c.bf16 %v548_v56, %v546_v55 }
 0x13a   :  { %1784 = vmatpush1.bf16.msra.mxu0 %v1783_v58  ;;  %v551_v58 = vld [vmem:[%s2656_s4 + $0x48] sm:$0xff] }
 0x13b   :  { %1786 = vmatprep.subr.bf16.mxu0 %v2280_v49  ;;  %v2314_v61 = vpack.c.bf16 %v553_v60, %v551_v58 }
 0x1b5   :  { %v93_v62 = vpop.xlane.xlu0 %92 }
 0x1b6   :  { %v94_v3 = vcvt.f32.s32 %v93_v62  ;;  %v550_v62 = vld [vmem:[%s2656_s4 + $0x40] sm:$0xff] }
 0x1b8   :  { %v97_v4 = vadd.s32 %v96_v63, %v94_v3  ;;  %v552_v63 = vld [vmem:[%s2656_s4 + $0x50] sm:$0xff]  ;;  %v555_v3 = vld [vmem:[%s2656_s4 + $0x68] sm:$0xff] }
 0x1b9   :  { %v108_v10 = vpop.xlane.xlu1 %107  ;;  %v123_v11 = vpop.xlane.xlu0 %122  ;;  %v2323_v2 = vpack.c.bf16 %v552_v63, %v550_v62 }
 0x1ba   :  { %v109_v13 = vcvt.f32.s32 %v108_v10  ;;  %v124_v14 = vcvt.f32.s32 %v123_v11  ;;  %vm203_vm2 = vcmp.eq.s32.totalorder %v2135_v17, %v97_v4  ;;  %v557_v4 = vld [vmem:[%s2656_s4 + $0x78] sm:$0xff]  ;;  %v2341_v10 = vpack.c.bf16 %v556_v7, %v554_v6 }
 0x1bb   :  { %v1656_v59 = vsel %vm203_vm2, 1.0, %v2043_v34 }
 0x1bc   :  { %v112_v0 = vadd.s32 %v111_v5, %v109_v13  ;;  %v127_v15 = vadd.s32 %v126_v12, %v124_v14  ;;  %1729 = vmatprep.mubr.msk.f32.mxu1 %vm40_vm0, %v1656_v59  ;;  %v2332_v5 = vpack.c.bf16 %v557_v4, %v555_v3 }
 0x1bd   :  { %v138_v9 = vpop.xlane.xlu1 %137  ;;  %v153_v22 = vpop.xlane.xlu0 %152 }
 0x1be   :  { %v139_v23 = vcvt.f32.s32 %v138_v9  ;;  %v154_v24 = vcvt.f32.s32 %v153_v22  ;;  %vm204_vm3 = vcmp.eq.s32.totalorder %v2135_v17, %v112_v0  ;;  %vm205_vm4 = vcmp.eq.s32.totalorder %v2135_v17, %v127_v15 }
 0x1bf   :  { %v1657_v26 = vsel %vm204_vm3, 1.0, %v2043_v34  ;;  %v1658_v27 = vsel %vm205_vm4, 1.0, %v2043_v34 }
 0x1c0   :  { %v142_v28 = vadd.s32 %v141_v1, %v139_v23  ;;  %v157_v29 = vadd.s32 %v156_v20, %v154_v24  ;;  %1730 = vmatmul.mubr.msk.f32.vlgmr.msra.gmra.mrb[0].mxu1 %vm40_vm0, %v1657_v26  ;;  %v379_v24 = vshrl.u32 %v65_v16, 7 }
 0x1c1   :  { %v168_v31 = vpop.xlane.xlu1 %167  ;;  %1732 = vmatprep.mubr.msk.f32.mxu1 %vm40_vm0, %v1658_v27  ;;  %v183_v32 = vpop.xlane.xlu0 %182  ;;  %1820 = vmatpush1.bf16.msra.mxu1 %v2285_v51 }
 0x1c2   :  { %v169_v33 = vcvt.f32.s32 %v168_v31  ;;  %v184_v35 = vcvt.f32.s32 %v183_v32  ;;  %vm206_vm5 = vcmp.eq.s32.totalorder %v2135_v17, %v142_v28  ;;  %vm207_vm6 = vcmp.eq.s32.totalorder %v2135_v17, %v157_v29  ;;  %1822 = vmatprep.subr.bf16.mxu1 %v2296_v54  ;;  %v376_v29 = vld [vmem:[%s2657_s3] sm:$0x3]  ;;  %s2045_s3 = smov 64  }
 0x1c3   :  { %v1659_v36 = vsel %vm206_vm5, 1.0, %v2043_v34  ;;  %v1660_v37 = vsel %vm207_vm6, 1.0, %v2043_v34  ;;  %v380_v28 = vsub.s32 0, %v379_v24 }
 0x1c4   :  { %v172_v38 = vadd.s32 %v171_v30, %v169_v33  ;;  %v187_v39 = vadd.s32 %v186_v18, %v184_v35  ;;  %1733 = vmatmul.mubr.msk.f32.gmra.mrb[2].mxu1 %vm40_vm0, %v1659_v36  ;;  %v558_v30 = vld [vmem:[%s2658_s5] sm:$0x3]  ;;  %v384_v18 = vsub.s32 1, %v379_v24  ;;  %v559_v33 = vadd.s32 128, %v2135_v17  ;;  %s2046_s5 = smov 32  }
 0x1c5   :  { %v198_v40 = vpop.xlane.xlu1 %197  ;;  %1735 = vmatprep.mubr.msk.f32.mxu1 %vm40_vm0, %v1660_v37  ;;  %1824 = vmatpush1.bf16.msra.mxu1 %v2304_v57  ;;  %v2406_v32 = vrot.slane %v376_v29, %v380_v28  ;;  %v2408_v16 = vrot.slane %v558_v30, %v380_v28 }
 0x1c6   :  { %v199_v41 = vcvt.f32.s32 %v198_v40  ;;  %vm208_vm7 = vcmp.eq.s32.totalorder %v2135_v17, %v172_v38  ;;  %vm209_vm8 = vcmp.eq.s32.totalorder %v2135_v17, %v187_v39  ;;  %1826 = vmatprep.subr.bf16.mxu1 %v2314_v61  ;;  %v2411_v35 = vrot.slane %v376_v29, %v384_v18 }
 0x1c7   :  { %v1661_v42 = vsel %vm208_vm7, 1.0, %v2043_v34  ;;  %v1662_v43 = vsel %vm209_vm8, 1.0, %v2043_v34  ;;  %v2413_v36 = vrot.slane %v558_v30, %v384_v18  ;;  %v1937_v39 = vadd.f32 %v2408_v16, %v2406_v32 }
 0x1c8   :  { %v202_v44 = vadd.s32 %v201_v25, %v199_v41  ;;  %1736 = vmatmul.mubr.msk.f32.gmra.mrb[4].mxu1 %vm40_vm0, %v1661_v42  ;;  %vm563_vm11 = vcmp.lt.s32.totalorder %v559_v33, 192 }
 0x1c9   :  { %1738 = vmatprep.mubr.msk.f32.mxu1 %vm40_vm0, %v1662_v43  ;;  %1828 = vmatpush1.bf16.msra.mxu1 %v2323_v2  ;;  %v1939_v40 = vadd.f32 %v2413_v36, %v2411_v35  ;;  %v2044_v43 = vmov 0.5  }
 0x1ca   :  { %vm210_vm9 = vcmp.eq.s32.totalorder %v2135_v17, %v202_v44  ;;  %1830 = vmatprep.subr.bf16.mxu1 %v2332_v5  ;;  %v2423_v44 = vsel %vm563_vm11, 1.0, %v2044_v43  ;;  %v1688_v17 = vld [vmem:[%s2662_s7] ss:$0 sm:$0xff] }
 0x1cb   :  { %v1663_v45 = vsel %vm210_vm9, 1.0, %v2043_v34 }
 0x1cc   :  { %1739 = vmatmul.mubr.msk.f32.gmra.mrb[6].mxu1 %vm40_vm0, %v1663_v45 }
 0x1cd   :  { %856 = vmatprep.mubr.f32.mxu1 %v2043_v34  ;;  %1832 = vmatpush1.bf16.msra.mxu1 %v2341_v10 }
 0x1ce   :  { %1834 = vmatprep.subr.bf16.mxu1 %v2280_v49 }
 0x293   :  { %v1731_v11 = vpop.f32.mrb[0].mxu1 }
 0x294   :  { %v321_v12 = vpop.f32.mrb[1].mxu1 }
 0x295   :  { %1672 = vmatmul.mubr.msk.f32.vlgmr.msra.gmra.mrb[0].mxu0 %vm388_vm10, %v321_v12 }
 0x296   :  { %1788 = vmatpush1.bf16.msra.mxu0 %v2285_v51  ;;  %483 = vmatprep.mubr.f32.mxu0 %v2043_v34 }
 0x297   :  { %v1734_v13 = vpop.f32.mrb[2].mxu1  ;;  %1790 = vmatprep.subr.bf16.mxu0 %v2296_v54 }
 0x298   :  { %v331_v14 = vpop.f32.mrb[3].mxu1 }
 0x299   :  { %1673 = vmatmul.mubr.msk.f32.gmra.mrb[2].mxu0 %vm388_vm10, %v1731_v11 }
 0x29a   :  { %489 = vmatprep.mubr.f32.mxu0 %v2043_v34  ;;  %1792 = vmatpush1.bf16.msra.mxu0 %v2304_v57 }
 0x29b   :  { %v1737_v59 = vpop.f32.mrb[4].mxu1  ;;  %1794 = vmatprep.subr.bf16.mxu0 %v2314_v61 }
 0x29c   :  { %v341_v0 = vpop.f32.mrb[5].mxu1 }
 0x29d   :  { %1674 = vmatmul.mubr.msk.f32.gmra.mrb[4].mxu0 %vm388_vm10, %v331_v14 }
 0x29e   :  { %495 = vmatprep.mubr.f32.mxu0 %v2043_v34  ;;  %1796 = vmatpush1.bf16.msra.mxu0 %v2323_v2 }
 0x29f   :  { %v1740_v15 = vpop.f32.mrb[6].mxu1  ;;  %1798 = vmatprep.subr.bf16.mxu0 %v2332_v5 }
 0x2a0   :  { %v351_v1 = vpop.f32.mrb[7].mxu1 }
 0x2a1   :  { %1675 = vmatmul.mubr.msk.f32.gmra.mrb[6].mxu0 %vm388_vm10, %v1734_v13 }
 0x2a2   :  { %501 = vmatprep.mubr.f32.mxu0 %v2043_v34  ;;  %1800 = vmatpush1.bf16.msra.mxu0 %v2341_v10 }
 0x2a3   :  { %1802 = vmatprep.subr.bf16.mxu0 %v2280_v49 }
 0x2a5   :  { %1676 = vmatmul.mubr.msk.f32.gmra.mrb[8].mxu0 %vm388_vm10, %v341_v0 }
 0x2a6   :  { %507 = vmatprep.mubr.f32.mxu0 %v2043_v34 }
 0x2a9   :  { %1677 = vmatmul.mubr.msk.f32.gmra.mrb[10].mxu0 %vm388_vm10, %v1737_v59 }
 0x2aa   :  { %513 = vmatprep.mubr.f32.mxu0 %v2043_v34 }
 0x2ad   :  { %1678 = vmatmul.mubr.msk.f32.gmra.mrb[12].mxu0 %vm388_vm10, %v351_v1 }
 0x2ae   :  { %519 = vmatprep.mubr.f32.mxu0 %v2043_v34 }
 0x2b1   :  { %1679 = vmatmul.mubr.msk.f32.gmra.mrb[14].mxu0 %vm388_vm10, %v1740_v15 }
 0x2b2   :  { %646 = vmatprep.mubr.f32.mxu0 %v2043_v34 }
 0x2b5   :  { %647 = vmatmul.mubr.f32.vlgmr.msra.gmra.mrb[0].mxu0 %v2043_v34 }
 0x2b6   :  { %1804 = vmatpush1.bf16.msra.mxu0 %v2285_v51  ;;  %754 = vmatprep.mubr.f32.mxu0 %v2043_v34 }
 0x2b7   :  { %1806 = vmatprep.subr.bf16.mxu0 %v2296_v54 }
 0x2ba   :  { %1808 = vmatpush1.bf16.msra.mxu0 %v2304_v57 }
 0x2bb   :  { %1810 = vmatprep.subr.bf16.mxu0 %v2314_v61 }
 0x2be   :  { %1812 = vmatpush1.bf16.msra.mxu0 %v2323_v2 }
 0x2bf   :  { %1814 = vmatprep.subr.bf16.mxu0 %v2332_v5 }
 0x2c2   :  { %1816 = vmatpush1.bf16.msra.mxu0 %v2341_v10 }
 0x2c3   :  { %1914 = vmatprep.subr.bf16.mxu0 %v2280_v49 }
 0x370   :  { %v2379_v20 = vpop.f32.mrb[4].mxu0 }
 0x371   :  { %v2381_v21 = vpop.f32.mrb[5].mxu0 }
 0x374   :  { %v2383_v8 = vpop.f32.mrb[6].mxu0 }
 0x375   :  { %v2385_v9 = vpop.f32.mrb[7].mxu0 }
 0x378   :  { %v2387_v22 = vpop.f32.mrb[8].mxu0 }
 0x379   :  { %v2389_v23 = vpop.f32.mrb[9].mxu0 }
 0x37c   :  { %v2392_v26 = vpop.f32.mrb[10].mxu0 }
 0x37d   :  { %v2394_v27 = vpop.f32.mrb[11].mxu0 }
 0x380   :  { %v2402_v19 = vpop.f32.mrb[12].mxu0 }
 0x381   :  { %v2404_v31 = vpop.f32.mrb[13].mxu0 }
 0x384   :  { %v2415_v37 = vpop.f32.mrb[14].mxu0 }
 0x385   :  { %v2417_v38 = vpop.f32.mrb[15].mxu0 }
 0x388   :  { %v648_v25 = vpop.f32.mrb[0].mxu0 }
 0x389   :  { %v1938_v41 = vadd.f32 %v1937_v39, %v648_v25  ;;  %v650_v42 = vpop.f32.mrb[1].mxu0 }
 0x38a   :  { %v1940_v45 = vadd.f32 %v1939_v40, %v650_v42 }
 0x38b   :  { %v657_v46 = vmul.f32 0.5, %v1938_v41 }
 0x38c   :  { %v658_v47 = vmul.f32 %v1940_v45, %v2423_v44 }
 0x38d   :  { %1989 = vtanh.f32 %v657_v46 }
 0x38e   :  { %1991 = vtanh.f32 %v658_v47  ;;  %v492_v47 = vadd.f32 %v2379_v20, %v2406_v32 }
 0x397   :  { %v1990_v48 = vpop.eup %1989 }
 0x398   :  { %v661_v50 = vmul.f32 0.5, %v1990_v48  ;;  %v1992_v53 = vpop.eup %1991  ;;  %v494_v48 = vadd.f32 %v2381_v21, %v2411_v35 }
 0x399   :  { %v663_v62 = vmul.f32 0.5, %v1992_v53 }
 0x39a   :  { %v662_v52 = vadd.f32 0.5, %v661_v50  ;;  %v1946_v50 = vadd.f32 %v2408_v16, %v492_v47 }
 0x39b   :  { %v664_v63 = vadd.f32 0.5, %v663_v62 }
 0x39c   :  { %v666_v55 = vmul.f32 %v1992_v53, %v662_v52  ;;  %v665_v56 = vmul.f32 0.0, %v662_v52  ;;  %v1949_v53 = vadd.f32 %v2413_v36, %v494_v48 }
 0x39e   :  { %668 = vrot.lane.b32.xlu0 %v666_v55, %s2045_s3 }
 0x410   :  { %v669_v58 = vpop.permute.xlu0 %668 }
 0x411   :  { %v671_v60 = vadd.f32 %v669_v58, %v665_v56 }
 0x413   :  { %1993 = vtanh.f32 %v671_v60 }
 0x41d   :  { %v1994_v3 = vpop.eup %1993 }
 0x41e   :  { %v673_v4 = vmul.f32 %v1994_v3, %v664_v63 }
 0x420   :  { %683 = vrot.lane.b32.xlu1 %v673_v4, %s2045_s3 }
 0x424   :  { %678 = vrot.lane.b32.xlu1 %v671_v60, %s2045_s3 }
 0x492   :  { %v684_v6 = vpop.permute.xlu1 %683 }
 0x493   :  { %v686_v7 = vsel %vm675_vm12, %v684_v6, 0.0 }
 0x494   :  { %1680 = vmatmul.mubr.msk.f32.vlgmr.msra.gmra.mrb[2].mxu0 %vm388_vm10, %v686_v7 }
 0x495   :  { %1916 = vmatpush1.bf16.msra.mxu0 %v2285_v51  ;;  %1444 = vmatprep.mubr.f32.mxu0 %v2043_v34 }
 0x496   :  { %v679_v11 = vpop.permute.xlu1 %678  ;;  %1918 = vmatprep.subr.bf16.mxu0 %v2296_v54 }
 0x497   :  { %v681_v12 = vsel %vm675_vm12, %v679_v11, 0.0 }
 0x498   :  { %775 = vrot.lane.b32.xlu1 %v681_v12, %s2045_s3 }
 0x499   :  { %1920 = vmatpush1.bf16.msra.mxu0 %v2304_v57 }
 0x49a   :  { %1922 = vmatprep.subr.bf16.mxu0 %v2314_v61 }
 0x49d   :  { %1924 = vmatpush1.bf16.msra.mxu0 %v2323_v2 }
 0x49e   :  { %1926 = vmatprep.subr.bf16.mxu0 %v2332_v5 }
 0x4a1   :  { %1928 = vmatpush1.bf16.msra.mxu0 %v2341_v10 }
 0x50a   :  { %v776_v33 = vpop.permute.xlu1 %775 }
 0x567   :  { %v756_v13 = vpop.f32.mrb[2].mxu0 }
 0x568   :  { %v1942_v14 = vadd.f32 %v1937_v39, %v756_v13  ;;  %v758_v59 = vpop.f32.mrb[3].mxu0 }
 0x569   :  { %v1944_v0 = vadd.f32 %v1939_v40, %v758_v59 }
 0x56a   :  { %v766_v15 = vmul.f32 0.5, %v1942_v14 }
 0x56b   :  { %v767_v1 = vmul.f32 %v1944_v0, %v2423_v44 }
 0x56c   :  { %1995 = vtanh.f32 %v766_v15  ;;  %v498_v15 = vadd.f32 %v2383_v8, %v2406_v32 }
 0x56d   :  { %1997 = vtanh.f32 %v767_v1  ;;  %v500_v1 = vadd.f32 %v2385_v9, %v2411_v35 }
 0x576   :  { %v1996_v24 = vpop.eup %1995 }
 0x577   :  { %v770_v28 = vmul.f32 0.5, %v1996_v24  ;;  %v1998_v30 = vpop.eup %1997  ;;  %v1952_v24 = vadd.f32 %v2408_v16, %v498_v15 }
 0x578   :  { %v772_v39 = vmul.f32 0.5, %v1998_v30 }
 0x579   :  { %v771_v29 = vadd.f32 0.5, %v770_v28 }
 0x57a   :  { %v773_v43 = vadd.f32 0.5, %v772_v39 }
 0x57b   :  { %v779_v18 = vmul.f32 %v1998_v30, %v771_v29  ;;  %v778_v25 = vmul.f32 %v776_v33, %v771_v29  ;;  %v1955_v29 = vadd.f32 %v2413_v36, %v500_v1 }
 0x57d   :  { %781 = vrot.lane.b32.xlu0 %v779_v18, %s2045_s3 }
 0x5ef   :  { %v782_v41 = vpop.permute.xlu0 %781 }
 0x5f0   :  { %v784_v42 = vadd.f32 %v782_v41, %v778_v25 }
 0x5f2   :  { %1999 = vtanh.f32 %v784_v42 }
 0x5fc   :  { %v2000_v40 = vpop.eup %1999 }
 0x5fd   :  { %v2442_v45 = vmul.f32 %v2000_v40, %v773_v43 }
 0x5ff   :  { %788 = vrot.lane.b32.xlu1 %v2442_v45, %s2045_s3 }
 0x671   :  { %v789_v46 = vpop.permute.xlu1 %788 }
 0x672   :  { %1681 = vmatmul.mubr.msk.f32.vlgmr.msra.gmra.mrb[8].mxu1 %vm388_vm10, %v789_v46 }
 0x673   :  { %1836 = vmatpush1.bf16.msra.mxu1 %v2285_v51  ;;  %954 = vmatprep.mubr.f32.mxu1 %v2043_v34 }
 0x674   :  { %1838 = vmatprep.subr.bf16.mxu1 %v2296_v54 }
 0x677   :  { %1840 = vmatpush1.bf16.msra.mxu1 %v2304_v57 }
 0x678   :  { %1842 = vmatprep.subr.bf16.mxu1 %v2314_v61 }
 0x67b   :  { %1844 = vmatpush1.bf16.msra.mxu1 %v2323_v2 }
 0x67c   :  { %1846 = vmatprep.subr.bf16.mxu1 %v2332_v5 }
 0x67f   :  { %1848 = vmatpush1.bf16.msra.mxu1 %v2341_v10 }
 0x680   :  { %1850 = vmatprep.subr.bf16.mxu1 %v2280_v49 }
 0x745   :  { %v858_v52 = vpop.f32.mrb[8].mxu1 }
 0x746   :  { %v1947_v55 = vadd.f32 %v1946_v50, %v858_v52  ;;  %v860_v56 = vpop.f32.mrb[9].mxu1 }
 0x747   :  { %v1950_v58 = vadd.f32 %v1949_v53, %v860_v56  ;;  %v504_v56 = vadd.f32 %v2387_v22, %v2406_v32 }
 0x748   :  { %v868_v60 = vmul.f32 0.5, %v1947_v55 }
 0x749   :  { %v869_v62 = vmul.f32 %v1950_v58, %v2423_v44  ;;  %v506_v58 = vadd.f32 %v2389_v23, %v2411_v35 }
 0x74a   :  { %2001 = vtanh.f32 %v868_v60  ;;  %v1958_v60 = vadd.f32 %v2408_v16, %v504_v56 }
 0x74b   :  { %2003 = vtanh.f32 %v869_v62 }
 0x754   :  { %v2002_v63 = vpop.eup %2001 }
 0x755   :  { %v872_v3 = vmul.f32 0.5, %v2002_v63  ;;  %v2004_v20 = vpop.eup %2003  ;;  %v1961_v63 = vadd.f32 %v2413_v36, %v506_v58 }
 0x756   :  { %v874_v12 = vmul.f32 0.5, %v2004_v20 }
 0x757   :  { %v873_v4 = vadd.f32 0.5, %v872_v3 }
 0x758   :  { %v875_v13 = vadd.f32 0.5, %v874_v12 }
 0x759   :  { %v877_v6 = vmul.f32 %v2004_v20, %v873_v4  ;;  %v876_v21 = vmul.f32 %v873_v4, %v784_v42 }
 0x75b   :  { %879 = vrot.lane.b32.xlu0 %v877_v6, %s2045_s3 }
 0x7cd   :  { %v880_v7 = vpop.permute.xlu0 %879 }
 0x7ce   :  { %v882_v11 = vadd.f32 %v880_v7, %v876_v21 }
 0x7d0   :  { %2005 = vtanh.f32 %v882_v11 }
 0x7da   :  { %v2006_v14 = vpop.eup %2005 }
 0x7db   :  { %v2464_v59 = vmul.f32 %v2006_v14, %v875_v13 }
 0x7dd   :  { %886 = vrot.lane.b32.xlu1 %v2464_v59, %s2045_s3 }
 0x84f   :  { %v887_v0 = vpop.permute.xlu1 %886 }
 0x850   :  { %1682 = vmatmul.mubr.msk.f32.vlgmr.msra.gmra.mrb[10].mxu1 %vm388_vm10, %v887_v0 }
 0x851   :  { %1852 = vmatpush1.bf16.msra.mxu1 %v2285_v51  ;;  %1052 = vmatprep.mubr.f32.mxu1 %v2043_v34 }
 0x852   :  { %1854 = vmatprep.subr.bf16.mxu1 %v2296_v54 }
 0x855   :  { %1856 = vmatpush1.bf16.msra.mxu1 %v2304_v57 }
 0x856   :  { %1858 = vmatprep.subr.bf16.mxu1 %v2314_v61 }
 0x859   :  { %1860 = vmatpush1.bf16.msra.mxu1 %v2323_v2 }
 0x85a   :  { %1862 = vmatprep.subr.bf16.mxu1 %v2332_v5 }
 0x85d   :  { %1864 = vmatpush1.bf16.msra.mxu1 %v2341_v10 }
 0x85e   :  { %1866 = vmatprep.subr.bf16.mxu1 %v2280_v49 }
 0x923   :  { %v956_v28 = vpop.f32.mrb[10].mxu1 }
 0x924   :  { %v1953_v30 = vadd.f32 %v1952_v24, %v956_v28  ;;  %v958_v18 = vpop.f32.mrb[11].mxu1 }
 0x925   :  { %v1956_v33 = vadd.f32 %v1955_v29, %v958_v18  ;;  %v512_v18 = vadd.f32 %v2394_v27, %v2411_v35 }
 0x926   :  { %v966_v25 = vmul.f32 0.5, %v1953_v30  ;;  %v510_v30 = vadd.f32 %v2392_v26, %v2406_v32 }
 0x927   :  { %v967_v41 = vmul.f32 %v1956_v33, %v2423_v44 }
 0x928   :  { %2007 = vtanh.f32 %v966_v25  ;;  %v1964_v33 = vadd.f32 %v2408_v16, %v510_v30 }
 0x929   :  { %2009 = vtanh.f32 %v967_v41  ;;  %v1967_v41 = vadd.f32 %v2413_v36, %v512_v18 }
 0x932   :  { %v2008_v42 = vpop.eup %2007 }
 0x933   :  { %v970_v39 = vmul.f32 0.5, %v2008_v42  ;;  %v2010_v8 = vpop.eup %2009 }
 0x934   :  { %v972_v48 = vmul.f32 0.5, %v2010_v8 }
 0x935   :  { %v971_v43 = vadd.f32 0.5, %v970_v39 }
 0x936   :  { %v973_v50 = vadd.f32 0.5, %v972_v48 }
 0x937   :  { %v975_v40 = vmul.f32 %v2010_v8, %v971_v43  ;;  %v974_v9 = vmul.f32 %v971_v43, %v882_v11 }
 0x939   :  { %977 = vrot.lane.b32.xlu0 %v975_v40, %s2045_s3 }
 0x9ab   :  { %v978_v46 = vpop.permute.xlu0 %977 }
 0x9ac   :  { %v980_v47 = vadd.f32 %v978_v46, %v974_v9 }
 0x9ae   :  { %2011 = vtanh.f32 %v980_v47 }
 0x9b8   :  { %v2012_v52 = vpop.eup %2011 }
 0x9b9   :  { %v2486_v53 = vmul.f32 %v2012_v52, %v973_v50 }
 0x9bb   :  { %984 = vrot.lane.b32.xlu1 %v2486_v53, %s2045_s3 }
 0xa2d   :  { %v985_v55 = vpop.permute.xlu1 %984 }
 0xa2e   :  { %1683 = vmatmul.mubr.msk.f32.vlgmr.msra.gmra.mrb[12].mxu1 %vm388_vm10, %v985_v55 }
 0xa2f   :  { %1868 = vmatpush1.bf16.msra.mxu1 %v2285_v51  ;;  %1150 = vmatprep.mubr.f32.mxu1 %v2043_v34 }
 0xa30   :  { %1870 = vmatprep.subr.bf16.mxu1 %v2296_v54 }
 0xa33   :  { %1872 = vmatpush1.bf16.msra.mxu1 %v2304_v57 }
 0xa34   :  { %1874 = vmatprep.subr.bf16.mxu1 %v2314_v61 }
 0xa37   :  { %1876 = vmatpush1.bf16.msra.mxu1 %v2323_v2 }
 0xa38   :  { %1878 = vmatprep.subr.bf16.mxu1 %v2332_v5 }
 0xa3b   :  { %1880 = vmatpush1.bf16.msra.mxu1 %v2341_v10 }
 0xa3c   :  { %1882 = vmatprep.subr.bf16.mxu1 %v2280_v49 }
 0xb01   :  { %v1054_v62 = vpop.f32.mrb[12].mxu1 }
 0xb02   :  { %v1959_v3 = vadd.f32 %v1958_v60, %v1054_v62  ;;  %v1056_v4 = vpop.f32.mrb[13].mxu1  ;;  %v516_v62 = vadd.f32 %v2402_v19, %v2406_v32 }
 0xb03   :  { %v1962_v20 = vadd.f32 %v1961_v63, %v1056_v4 }
 0xb04   :  { %v1064_v6 = vmul.f32 0.5, %v1959_v3 }
 0xb05   :  { %v1065_v21 = vmul.f32 %v1962_v20, %v2423_v44 }
 0xb06   :  { %2013 = vtanh.f32 %v1064_v6 }
 0xb07   :  { %2015 = vtanh.f32 %v1065_v21 }
 0xb10   :  { %v2014_v7 = vpop.eup %2013 }
 0xb11   :  { %v1068_v11 = vmul.f32 0.5, %v2014_v7  ;;  %v2016_v22 = vpop.eup %2015 }
 0xb12   :  { %v1070_v15 = vmul.f32 0.5, %v2016_v22 }
 0xb13   :  { %v1069_v12 = vadd.f32 0.5, %v1068_v11 }
 0xb14   :  { %v1071_v1 = vadd.f32 0.5, %v1070_v15 }
 0xb15   :  { %v1073_v13 = vmul.f32 %v2016_v22, %v1069_v12  ;;  %v1072_v23 = vmul.f32 %v1069_v12, %v980_v47 }
 0xb17   :  { %1075 = vrot.lane.b32.xlu0 %v1073_v13, %s2045_s3 }
 0xb89   :  { %v1076_v14 = vpop.permute.xlu0 %1075 }
 0xb8a   :  { %v1078_v0 = vadd.f32 %v1076_v14, %v1072_v23  ;;  %v522_v14 = vadd.f32 %v2415_v37, %v2406_v32 }
 0xb8c   :  { %2017 = vtanh.f32 %v1078_v0  ;;  %v1976_v15 = vadd.f32 %v2408_v16, %v522_v14 }
 0xb96   :  { %v2018_v24 = vpop.eup %2017 }
 0xb97   :  { %v2508_v28 = vmul.f32 %v2018_v24, %v1071_v1 }
 0xb99   :  { %1082 = vrot.lane.b32.xlu1 %v2508_v28, %s2045_s3 }
 0xc0b   :  { %v1083_v29 = vpop.permute.xlu1 %1082 }
 0xc0c   :  { %1684 = vmatmul.mubr.msk.f32.vlgmr.msra.gmra.mrb[14].mxu1 %vm388_vm10, %v1083_v29 }
 0xc0d   :  { %1884 = vmatpush1.bf16.msra.mxu1 %v2285_v51  ;;  %1248 = vmatprep.mubr.f32.mxu1 %v2043_v34 }
 0xc0e   :  { %1886 = vmatprep.subr.bf16.mxu1 %v2296_v54 }
 0xc11   :  { %1888 = vmatpush1.bf16.msra.mxu1 %v2304_v57 }
 0xc12   :  { %1890 = vmatprep.subr.bf16.mxu1 %v2314_v61 }
 0xc15   :  { %1892 = vmatpush1.bf16.msra.mxu1 %v2323_v2 }
 0xc16   :  { %1894 = vmatprep.subr.bf16.mxu1 %v2332_v5 }
 0xc19   :  { %1896 = vmatpush1.bf16.msra.mxu1 %v2341_v10 }
 0xc1a   :  { %1898 = vmatprep.subr.bf16.mxu1 %v2280_v49 }
 0xcdf   :  { %v1152_v25 = vpop.f32.mrb[14].mxu1 }
 0xce0   :  { %v1965_v42 = vadd.f32 %v1964_v33, %v1152_v25  ;;  %v1154_v39 = vpop.f32.mrb[15].mxu1 }
 0xce1   :  { %v1968_v43 = vadd.f32 %v1967_v41, %v1154_v39 }
 0xce2   :  { %v1162_v8 = vmul.f32 0.5, %v1965_v42 }
 0xce3   :  { %v1163_v40 = vmul.f32 %v1968_v43, %v2423_v44 }
 0xce4   :  { %2019 = vtanh.f32 %v1162_v8 }
 0xce5   :  { %2021 = vtanh.f32 %v1163_v40 }
 0xcee   :  { %v2020_v49 = vpop.eup %2019 }
 0xcef   :  { %v1166_v9 = vmul.f32 0.5, %v2020_v49  ;;  %v2022_v26 = vpop.eup %2021 }
 0xcf0   :  { %v1168_v52 = vmul.f32 0.5, %v2022_v26 }
 0xcf1   :  { %v1167_v46 = vadd.f32 0.5, %v1166_v9 }
 0xcf2   :  { %v1169_v55 = vadd.f32 0.5, %v1168_v52 }
 0xcf3   :  { %v1171_v47 = vmul.f32 %v2022_v26, %v1167_v46  ;;  %v1170_v27 = vmul.f32 %v1167_v46, %v1078_v0  ;;  %v524_v0 = vadd.f32 %v2417_v38, %v2411_v35 }
 0xcf5   :  { %1173 = vrot.lane.b32.xlu0 %v1171_v47, %s2045_s3  ;;  %v1979_v24 = vadd.f32 %v2413_v36, %v524_v0 }
 0xd67   :  { %v1174_v48 = vpop.permute.xlu0 %1173 }
 0xd68   :  { %v1176_v50 = vadd.f32 %v1174_v48, %v1170_v27 }
 0xd6a   :  { %2023 = vtanh.f32 %v1176_v50 }
 0xd74   :  { %v2024_v56 = vpop.eup %2023 }
 0xd75   :  { %v2530_v58 = vmul.f32 %v2024_v56, %v1169_v55 }
 0xd77   :  { %1180 = vrot.lane.b32.xlu1 %v2530_v58, %s2045_s3 }
 0xde9   :  { %v1181_v60 = vpop.permute.xlu1 %1180 }
 0xdea   :  { %1685 = vmatmul.mubr.msk.f32.vlgmr.msra.gmra.mrb[16].mxu1 %vm388_vm10, %v1181_v60  ;;  %v1491_v60 = vld [vmem:[%s2659_s6 + $0x18] sm:$0xff] }
 0xdeb   :  { %1900 = vmatpush1.bf16.msra.mxu1 %v2285_v51  ;;  %1346 = vmatprep.mubr.f32.mxu1 %v2043_v34  ;;  %v518_v51 = vadd.f32 %v2404_v31, %v2411_v35  ;;  %v1970_v34 = vadd.f32 %v2408_v16, %v516_v62 }
 0xdec   :  { %1902 = vmatprep.subr.bf16.mxu1 %v2296_v54 }
 0xded   :  { %v1973_v54 = vadd.f32 %v2413_v36, %v518_v51 }
 0xdef   :  { %1904 = vmatpush1.bf16.msra.mxu1 %v2304_v57 }
 0xdf0   :  { %1906 = vmatprep.subr.bf16.mxu1 %v2314_v61 }
 0xdf3   :  { %1908 = vmatpush1.bf16.msra.mxu1 %v2323_v2 }
 0xdf4   :  { %1910 = vmatprep.subr.bf16.mxu1 %v2332_v5 }
 0xdf7   :  { %1912 = vmatpush1.bf16.msra.mxu1 %v2341_v10 }
 0xebd   :  { %v1250_v63 = vpop.f32.mrb[16].mxu1 }
 0xebe   :  { %v1971_v57 = vadd.f32 %v1970_v34, %v1250_v63  ;;  %v1252_v3 = vpop.f32.mrb[17].mxu1 }
 0xebf   :  { %v1974_v61 = vadd.f32 %v1973_v54, %v1252_v3 }
 0xec0   :  { %v1260_v4 = vmul.f32 0.5, %v1971_v57 }
 0xec1   :  { %v1261_v2 = vmul.f32 %v1974_v61, %v2423_v44 }
 0xec2   :  { %2025 = vtanh.f32 %v1260_v4 }
 0xec3   :  { %2027 = vtanh.f32 %v1261_v2 }
 0xecc   :  { %v2026_v5 = vpop.eup %2025 }
 0xecd   :  { %v1264_v10 = vmul.f32 0.5, %v2026_v5  ;;  %v2028_v19 = vpop.eup %2027 }
 0xece   :  { %v1266_v11 = vmul.f32 0.5, %v2028_v19 }
 0xecf   :  { %v1265_v20 = vadd.f32 0.5, %v1264_v10 }
 0xed0   :  { %v1267_v12 = vadd.f32 0.5, %v1266_v11 }
 0xed1   :  { %v1269_v6 = vmul.f32 %v2028_v19, %v1265_v20  ;;  %v1268_v31 = vmul.f32 %v1265_v20, %v1176_v50 }
 0xed3   :  { %1271 = vrot.lane.b32.xlu0 %v1269_v6, %s2045_s3 }
 0xf45   :  { %v1272_v21 = vpop.permute.xlu0 %1271 }
 0xf46   :  { %v1274_v7 = vadd.f32 %v1272_v21, %v1268_v31 }
 0xf48   :  { %2029 = vtanh.f32 %v1274_v7 }
 0xf52   :  { %v2030_v22 = vpop.eup %2029 }
 0xf53   :  { %v2551_v13 = vmul.f32 %v2030_v22, %v1267_v12 }
 0xf55   :  { %1278 = vrot.lane.b32.xlu1 %v2551_v13, %s2045_s3 }
 0xfc7   :  { %v1279_v23 = vpop.permute.xlu1 %1278 }
 0xfc8   :  { %1686 = vmatmul.mubr.msk.f32.vlgmr.msra.gmra.mrb[18].mxu1 %vm388_vm10, %v1279_v23 }
0x109b   :  { %v1348_v1 = vpop.f32.mrb[18].mxu1 }
0x109c   :  { %v1977_v29 = vadd.f32 %v1976_v15, %v1348_v1  ;;  %v1350_v30 = vpop.f32.mrb[19].mxu1 }
0x109d   :  { %v1980_v18 = vadd.f32 %v1979_v24, %v1350_v30 }
0x109e   :  { %v1358_v33 = vmul.f32 0.5, %v1977_v29 }
0x109f   :  { %v1359_v25 = vmul.f32 %v1980_v18, %v2423_v44 }
0x10a0   :  { %2031 = vtanh.f32 %v1358_v33 }
0x10a1   :  { %2033 = vtanh.f32 %v1359_v25 }
0x10aa   :  { %v2032_v41 = vpop.eup %2031 }
0x10ab   :  { %v1362_v42 = vmul.f32 0.5, %v2032_v41  ;;  %v2034_v32 = vpop.eup %2033 }
0x10ac   :  { %v1364_v8 = vmul.f32 0.5, %v2034_v32 }
0x10ad   :  { %v1363_v39 = vadd.f32 0.5, %v1362_v42 }
0x10ae   :  { %v1365_v40 = vadd.f32 0.5, %v1364_v8 }
0x10af   :  { %v1367_v37 = vmul.f32 %v2034_v32, %v1363_v39  ;;  %v1366_v35 = vmul.f32 %v1363_v39, %v1274_v7 }
0x10b1   :  { %1369 = vrot.lane.b32.xlu0 %v1367_v37, %s2045_s3 }
0x1123   :  { %v1370_v38 = vpop.permute.xlu0 %1369 }
0x1124   :  { %v2564_v43 = vadd.f32 %v1370_v38, %v1366_v35 }
0x1126   :  { %2035 = vtanh.f32 %v2564_v43 }
0x1130   :  { %v2036_v49 = vpop.eup %2035 }
0x1131   :  { %v1374_v9 = vmul.f32 %v2036_v49, %v1365_v40 }
0x1133   :  { %1376 = vrot.lane.b32.xlu1 %v1374_v9, %s2045_s3 }
0x1137   :  { %1499 = vrot.lane.b32.xlu1 %v2442_v45, %s2046_s5  ;;  %v1488_v45 = vld [vmem:[%s2659_s6] sm:$0xff] }
0x113b   :  { %1503 = vrot.lane.b32.xlu1 %v2486_v53, %s2046_s5  ;;  %v1489_v53 = vld [vmem:[%s2659_s6 + $0x8] sm:$0xff] }
0x113c   :  { %v1929_v47 = vpack.c.bf16 %v1489_v53, %v1488_v45 }
0x113e   :  { %1930 = vmatprep.subr.bf16.mxu0 %v1929_v47 }
0x113f   :  { %1507 = vrot.lane.b32.xlu1 %v2530_v58, %s2046_s5  ;;  %v1490_v58 = vld [vmem:[%s2659_s6 + $0x10] sm:$0xff] }
0x1140   :  { %v1933_v62 = vpack.c.bf16 %v1491_v60, %v1490_v58 }
0x1143   :  { %1511 = vrot.lane.b32.xlu1 %v1374_v9, %s2046_s5 }
0x11a5   :  { %v2575_v46 = vpop.permute.xlu1 %1376 }
0x11a6   :  { %1687 = vmatmul.mubr.msk.f32.vlgmr.msra.gmra.mrb[16].mxu0 %vm388_vm10, %v2575_v46 }
0x11a7   :  { %1932 = vmatpush3.bf16.msra.mxu0 %v1929_v47 }
0x11a8   :  { %1934 = vmatprep.subr.bf16.mxu0 %v1933_v62 }
0x11a9   :  { %v1500_v26 = vpop.permute.xlu1 %1499 }
0x11aa   :  { %1749 = vmatprep.mubr.msk.f32.mxu0 %vm40_vm0, %v1500_v26 }
0x11ab   :  { %1936 = vmatpush3.bf16.msra.mxu0 %v1933_v62 }
0x11ad   :  { %v1504_v57 = vpop.permute.xlu1 %1503 }
0x1279   :  { %v1446_v27 = vpop.f32.mrb[16].mxu0 }
0x127a   :  { %v1447_v48 = vadd.f32 %v1446_v27, %v2408_v16  ;;  %v1448_v50 = vpop.f32.mrb[17].mxu0 }
0x127b   :  { %v1449_v52 = vadd.f32 %v1448_v50, %v2413_v36 }
0x127c   :  { %v1451_v55 = vmul.f32 0.5, %v1447_v48 }
0x127d   :  { %v1452_v56 = vmul.f32 %v1449_v52, %v2423_v44 }
0x127e   :  { %2037 = vtanh.f32 %v1451_v55 }
0x127f   :  { %2039 = vtanh.f32 %v1452_v56 }
0x1288   :  { %v2038_v16 = vpop.eup %2037 }
0x1289   :  { %v1455_v51 = vmul.f32 0.5, %v2038_v16  ;;  %v2040_v36 = vpop.eup %2039 }
0x128a   :  { %v1457_v2 = vmul.f32 0.5, %v2040_v36 }
0x128b   :  { %v1456_v34 = vadd.f32 0.5, %v1455_v51 }
0x128c   :  { %v1458_v5 = vadd.f32 0.5, %v1457_v2 }
0x128d   :  { %v1460_v63 = vmul.f32 %v2040_v36, %v1456_v34  ;;  %v1459_v44 = vmul.f32 %v1456_v34, %v2564_v43 }
0x128f   :  { %1462 = vrot.lane.b32.xlu0 %v1460_v63, %s2045_s3 }
0x1293   :  { %1501 = vrot.lane.b32.xlu0 %v2464_v59, %s2046_s5  ;;  %v1508_v59 = vpop.permute.xlu1 %1507 }
0x1297   :  { %1505 = vrot.lane.b32.xlu0 %v2508_v28, %s2046_s5  ;;  %v1512_v20 = vpop.permute.xlu1 %1511 }
0x129b   :  { %1509 = vrot.lane.b32.xlu0 %v2551_v13, %s2046_s5 }
0x1301   :  { %v1463_v54 = vpop.permute.xlu0 %1462 }
0x1302   :  { %v1465_v3 = vadd.f32 %v1463_v54, %v1459_v44 }
0x1304   :  { %2041 = vtanh.f32 %v1465_v3  ;;  %1472 = vrot.lane.b32.xlu1 %v1465_v3, %s2045_s3 }
0x1305   :  { %v1502_v61 = vpop.permute.xlu0 %1501 }
0x1306   :  { %1750 = vmatmul.mubr.msk.f32.vlgmr.msra.gmra.mrb[18].mxu0 %vm40_vm0, %v1502_v61 }
0x1307   :  { %1752 = vmatprep.mubr.msk.f32.mxu0 %vm40_vm0, %v1504_v57 }
0x1309   :  { %v1506_v4 = vpop.permute.xlu0 %1505 }
0x130a   :  { %1753 = vmatmul.mubr.msk.f32.gmra.mrb[20].mxu0 %vm40_vm0, %v1506_v4 }
0x130b   :  { %1755 = vmatprep.mubr.msk.f32.mxu0 %vm40_vm0, %v1508_v59 }
0x130d   :  { %v1510_v28 = vpop.permute.xlu0 %1509 }
0x130e   :  { %v2042_v10 = vpop.eup %2041  ;;  %1756 = vmatmul.mubr.msk.f32.gmra.mrb[22].mxu0 %vm40_vm0, %v1510_v28 }
0x130f   :  { %1758 = vmatprep.mubr.msk.f32.mxu0 %vm40_vm0, %v1512_v20  ;;  %v1467_v19 = vmul.f32 %v2042_v10, %v1458_v5 }
0x1311   :  { %1481 = vrot.lane.b32.xlu1 %v1467_v19, %s2045_s3  ;;  %1513 = vrot.lane.b32.xlu0 %v1467_v19, %s2046_s5 }
0x1315   :  { %1476 = vrot.lane.b32.xlu0 %v2564_v43, %s2045_s3 }
0x1376   :  { %v1473_v6 = vpop.permute.xlu1 %1472 }
0x1383   :  { %v1514_v31 = vpop.permute.xlu0 %1513  ;;  %v1482_v21 = vpop.permute.xlu1 %1481 }
0x1384   :  { %v1485_v7 = vsel %vm1470_vm15, %v1482_v21, %v2575_v46  ;;  %1759 = vmatmul.mubr.msk.f32.gmra.mrb[24].mxu0 %vm40_vm0, %v1514_v31 }
0x1385   :  { %1486 = vst.msk [vmem:[%s2660_s9] sm:$0xff] %vm388_vm10, %v1485_v7 }
0x1387   :  { %v1477_v11 = vpop.permute.xlu0 %1476 }
0x1388   :  { %v1479_v12 = vsel %vm1470_vm15, %v1473_v6, %v1477_v11 }
0x1389   :  { %1487 = vst.msk [vmem:[%s2661_s10] sm:$0xff] %vm388_vm10, %v1479_v12 }
0x13d9   :  { %v1751_v22 = vpop.f32.mrb[18].mxu0 }
0x13da   :  { %v1603_v13 = vadd.f32 %v1751_v22, %v1688_v17  ;;  %v1597_v23 = vpop.f32.mrb[19].mxu0 }
0x13db   :  { %v1598_v14 = vadd.f32 %v1688_v17, %v1597_v23 }
0x13dc   :  { %1637 = vst [vmem:[%s2663_s8 + $0x8] sm:$0xff] %v1603_v13 }
0x13dd   :  { %1636 = vst [vmem:[%s2663_s8] sm:$0xff] %v1598_v14  ;;  %v1754_v0 = vpop.f32.mrb[20].mxu0 }
0x13de   :  { %v1613_v15 = vadd.f32 %v1754_v0, %v1688_v17  ;;  %v1607_v1 = vpop.f32.mrb[21].mxu0 }
0x13df   :  { %v1608_v24 = vadd.f32 %v1688_v17, %v1607_v1 }
0x13e0   :  { %1639 = vst [vmem:[%s2663_s8 + $0x18] sm:$0xff] %v1613_v15 }
0x13e1   :  { %1638 = vst [vmem:[%s2663_s8 + $0x10] sm:$0xff] %v1608_v24  ;;  %v1757_v29 = vpop.f32.mrb[22].mxu0 }
0x13e2   :  { %v1623_v30 = vadd.f32 %v1757_v29, %v1688_v17  ;;  %v1617_v18 = vpop.f32.mrb[23].mxu0 }
0x13e3   :  { %v1618_v33 = vadd.f32 %v1688_v17, %v1617_v18 }
0x13e4   :  { %1641 = vst [vmem:[%s2663_s8 + $0x28] sm:$0xff] %v1623_v30 }
0x13e5   :  { %1640 = vst [vmem:[%s2663_s8 + $0x20] sm:$0xff] %v1618_v33 }
0x1457   :  { %v1760_v25 = vpop.f32.mrb[24].mxu0 }
0x1458   :  { %v1633_v41 = vadd.f32 %v1760_v25, %v1688_v17  ;;  %v1627_v42 = vpop.f32.mrb[25].mxu0 }
0x1459   :  { %v1628_v39 = vadd.f32 %v1688_v17, %v1627_v42 }
0x145a   :  { %1643 = vst [vmem:[%s2663_s8 + $0x38] sm:$0xff] %v1633_v41 }
0x145b   :  { %1642 = vst [vmem:[%s2663_s8 + $0x30] sm:$0xff] %v1628_v39 }

</bundles_post_ra>
